<compile_context>
chip_gen: v6e
topology: v6e:2x2x1
jax: 0.10.0
libtpu: 0.0.40
codegen_flags: <defaults>
</compile_context>

<pallas_src>
import functools
import math

import jax
import jax.numpy as jnp
from jax import lax
from jax.experimental import pallas as pl
from jax.experimental.pallas import tpu as pltpu

_LN_EPS = 1e-5  # torch.nn.LayerNorm default


def _embed_kernel(x_ref, w_ref, pp_ref, pos_ref, o_ref, *, e_real):
    """x_ref: (TB*N, P) patches; w_ref: (P, Ep); pp_ref: (4, Ep) = [bias, gamma, beta,
    class_token + pos[0]]; pos_ref: (N, Ep) = pos[1:]; o_ref: (TB, N+1, Ep)."""
    tb, n1, ep = o_ref.shape
    n = n1 - 1

    # Linear: one large MXU matmul over all TB*N patch rows, f32 accumulation.
    h = jnp.dot(x_ref[...], w_ref[...], preferred_element_type=jnp.float32)
    h = h + pp_ref[0:1, :].astype(jnp.float32)                     # + bias

    # One-pass LayerNorm statistics over the *true* embed width (padded columns of h
    # are exactly zero, so the sums are unaffected; divide by e_real, not Ep).
    inv_e = jnp.float32(1.0 / e_real)
    mean = jnp.sum(h, axis=-1, keepdims=True) * inv_e
    msq = jnp.sum(h * h, axis=-1, keepdims=True) * inv_e
    var = msq - mean * mean
    y = (h - mean) * lax.rsqrt(var + _LN_EPS)
    y = y * pp_ref[1:2, :].astype(jnp.float32) + pp_ref[2:3, :].astype(jnp.float32)

    # Positional embedding for the patch rows (output rows 1..N).
    # NOTE: assumes N (patches per image) is a multiple of 8 so this reshape is a
    # layout-trivial split of the row dim (true for square power-of-two ViT configs).
    y = y.reshape(tb, n, ep) + pos_ref[...].astype(jnp.float32)

    # Patch embeddings -> output rows 1..N; row 0 is the batch-invariant class row
    # (class_token + pos[0]), written with a single aligned 1-row store.
    o_ref[:, pl.ds(1, n), :] = y.astype(o_ref.dtype)
    cls_row = pp_ref[3:4, :].astype(o_ref.dtype).reshape(1, 1, ep)
    o_ref[:, pl.ds(0, 1), :] = jnp.broadcast_to(cls_row, (tb, 1, ep))
    # TODO(synk): add pltpu.prng_random_bits-based dropout if a nonzero rate is needed.


def _pick_batch_tile(batch, rows_per_batch, target_rows=512):
    """Largest divisor of `batch` whose tile reaches ~target_rows matmul rows while
    keeping at least 2 grid steps (so both v7x TensorCores get work)."""
    cap = max(1, target_rows // max(rows_per_batch, 1))
    divisors = [d for d in range(1, batch + 1) if batch % d == 0]
    preferred = [d for d in divisors if d <= cap and batch // d >= 2]
    if preferred:
        return max(preferred)
    fallback = [d for d in divisors if d <= cap]
    return max(fallback) if fallback else 1


def embedding_creation(x, w, b, gamma, beta, class_token, pos_embedding, *,
                       patch_size, compute_dtype=None):
    """x: (B, C, H, W). w: (P, E) pre-transposed Linear weight, P = C*patch_size^2.
    b, gamma, beta, class_token: (E,). pos_embedding: (num_patches+1, E).
    compute_dtype: optional MXU feed dtype (e.g. jnp.bfloat16); epilogue stays f32.
    Returns (B, num_patches+1, E)."""
    B, C, H, W = x.shape
    p = patch_size
    hh, ww = H // p, W // p
    N = hh * ww
    P = C * p * p
    E = w.shape[1]
    N1 = N + 1
    f32 = jnp.float32

    # Rearrange 'b c (h p1) (w p2) -> b (h w) (c p1 p2)' (layout plumbing, no compute),
    # flattened to (B*N, P) so the kernel sees a 2-D matmul-ready block.
    patches = x.reshape(B, C, hh, p, ww, p).transpose(0, 2, 4, 1, 3, 5).reshape(B * N, P)
    if compute_dtype is not None:
        # Cast fuses into the transpose pass; halves the patch/weight DMA bytes.
        patches = patches.astype(compute_dtype)
        w = w.astype(compute_dtype)

    # Lane-dense embedding width: pad E up to a multiple of 128 (parameters only).
    # Padded bias/gamma/beta/pos columns are zero, so padded output columns are exactly
    # zero and are sliced off at the end. For E % 128 == 0 nothing is padded.
    Ep = E if E % 128 == 0 else ((E + 127) // 128) * 128
    pad_e = Ep - E
    w_p = jnp.pad(w, ((0, 0), (0, pad_e))) if pad_e else w

    pos2 = pos_embedding.reshape(N1, E)
    cls_row = class_token.reshape(-1).astype(f32) + pos2[0].astype(f32)
    params4 = jnp.stack(
        [b.astype(f32), gamma.astype(f32), beta.astype(f32), cls_row], axis=0)   # (4, E)
    pos_patch = pos2[1:].astype(f32)                                             # (N, E)
    if pad_e:
        params4 = jnp.pad(params4, ((0, 0), (0, pad_e)))
        pos_patch = jnp.pad(pos_patch, ((0, 0), (0, pad_e)))

    # Batch folding: TB images per grid step -> TB*N matmul rows per step.
    tb = _pick_batch_tile(B, N)

    def vmem_bytes(t):
        # Streamed blocks are double-buffered; resident blocks counted x2 as well
        # (constant index maps are not re-fetched, but buffers still exist).
        stream = 2 * (t * N * P * patches.dtype.itemsize + t * N1 * Ep * x.dtype.itemsize)
        resident = 2 * (P * Ep * w_p.dtype.itemsize + (4 + N) * Ep * 4)
        return stream + resident

    while tb > 1 and vmem_bytes(tb) > 40 * 1024 * 1024:
        tb = max(d for d in range(1, tb) if B % d == 0)

    cp_kwargs = {"dimension_semantics": ("parallel",)}
    est = vmem_bytes(tb)
    if est > 24 * 1024 * 1024:
        # Only raise the scoped VMEM limit when the tiles actually need it (v7x has
        # 64 MiB physical VMEM; the TB cap above keeps us under that).
        cp_kwargs["vmem_limit_bytes"] = min(64 * 1024 * 1024, est + 16 * 1024 * 1024)

    kernel = functools.partial(_embed_kernel, e_real=float(E))

    out = pl.pallas_call(
        kernel,
        out_shape=jax.ShapeDtypeStruct((B, N1, Ep), x.dtype),
        grid_spec=pltpu.PrefetchScalarGridSpec(
            num_scalar_prefetch=0,
            grid=(B // tb,),
            in_specs=[
                # Streamed per-step patch rows.
                pl.BlockSpec((tb * N, P), lambda i: (i, 0)),
                # Resident operands: constant index maps (not re-fetched across steps).
                # TODO(synk): single-buffer these via pipeline_mode=pl.Buffered(1) to
                # reclaim VMEM headroom on v7x for bigger batch tiles.
                pl.BlockSpec((P, Ep), lambda i: (0, 0)),          # weight
                pl.BlockSpec((4, Ep), lambda i: (0, 0)),          # bias/gamma/beta/cls+pos0
                pl.BlockSpec((N, Ep), lambda i: (0, 0)),          # pos[1:]
            ],
            out_specs=pl.BlockSpec((tb, N1, Ep), lambda i: (i, 0, 0)),
        ),
        compiler_params=pltpu.CompilerParams(**cp_kwargs),
    )(patches, w_p, params4, pos_patch)

    if pad_e:
        out = out[:, :, :E]
    return out


def _init_params(key, in_chans, patch_size, embed_dim, num_patches, dtype=jnp.float32):
    """Linear init mimics torch.nn.Linear default; class token / pos embedding get small
    random values (the torch module inits them to zeros, which would not exercise the
    class-row / pos-add paths)."""
    P = in_chans * patch_size * patch_size
    k1, k2, k3, k4 = jax.random.split(key, 4)
    bound = 1.0 / math.sqrt(P)
    w = jax.random.uniform(k1, (P, embed_dim), dtype, -bound, bound)   # stored (in, out)
    b = jax.random.uniform(k2, (embed_dim,), dtype, -bound, bound)
    gamma = jnp.ones((embed_dim,), dtype)
    beta = jnp.zeros((embed_dim,), dtype)
    cls = 0.02 * jax.random.normal(k3, (embed_dim,), dtype)
    pos = 0.02 * jax.random.normal(k4, (num_patches + 1, embed_dim), dtype)
    return w, b, gamma, beta, cls, pos


def _reference(x, w, b, gamma, beta, cls, pos, patch_size):
    B, C, H, W = x.shape
    p = patch_size
    hh, ww = H // p, W // p
    patches = x.reshape(B, C, hh, p, ww, p).transpose(0, 2, 4, 1, 3, 5).reshape(B, hh * ww, -1)
    lin = patches @ w + b
    mean = lin.mean(-1, keepdims=True)
    var = ((lin - mean) ** 2).mean(-1, keepdims=True)
    ln = (lin - mean) / jnp.sqrt(var + _LN_EPS) * gamma + beta
    cls_b = jnp.broadcast_to(cls.reshape(1, 1, -1), (B, 1, cls.shape[-1]))
    out = jnp.concatenate([cls_b, ln], axis=1) + pos.reshape(1, *pos.shape)
    return out


if __name__ == "__main__":
    # Small shapes consistent with the module defaults:
    # img_size=32, patch_size=4, in_chans=3, embed_dim=48 -> num_patches = 64.
    # B=16 so batch folding kicks in (TB=8 -> 512 matmul rows/step, grid of 2 steps).
    B, C, img_size, patch_size, embed_dim = 16, 3, 32, 4, 48
    num_patches = (img_size // patch_size) ** 2

    key = jax.random.PRNGKey(0)
    kx, kp = jax.random.split(key)
    x = jax.random.normal(kx, (B, C, img_size, img_size), jnp.float32)
    w, b, gamma, beta, cls, pos = _init_params(kp, C, patch_size, embed_dim, num_patches)

    ref = _reference(x, w, b, gamma, beta, cls, pos, patch_size)

    # f32 path: validates tightly against the reference.
    out = embedding_creation(x, w, b, gamma, beta, cls, pos, patch_size=patch_size)
    jax.block_until_ready(out)
    assert out.shape == (B, num_patches + 1, embed_dim), out.shape
    assert jnp.allclose(out, ref, atol=1e-4, rtol=1e-4)

    # bf16 MXU-feed path: half the patch/weight HBM bytes, f32 epilogue kept.
    out_bf16 = embedding_creation(x, w, b, gamma, beta, cls, pos,
                                  patch_size=patch_size, compute_dtype=jnp.bfloat16)
    jax.block_until_ready(out_bf16)
    assert out_bf16.shape == (B, num_patches + 1, embed_dim), out_bf16.shape
    assert jnp.allclose(out_bf16, ref, atol=1e-1, rtol=5e-2)

    print("KERNEL_OK")
</pallas_src>

<mosaic_0001>
module attributes {stable_mosaic.version = 11 : i64} {
  func.func @_embed_kernel(%arg0: i32, %arg1: memref<512x48xf32, #tpu.memory_space<vmem>>, %arg2: memref<48x128xf32, #tpu.memory_space<vmem>>, %arg3: memref<4x128xf32, #tpu.memory_space<vmem>>, %arg4: memref<64x128xf32, #tpu.memory_space<vmem>>, %arg5: memref<8x65x128xf32, #tpu.memory_space<vmem>>) attributes {dimension_semantics = [#tpu.dimension_semantics<parallel>], iteration_bounds = array<i64: 2>, scalar_prefetch = 0 : i64, scratch_operands = 0 : i64, tpu.core_type = #tpu.core_type<tc>, window_params = [{transform_indices = @transform_0, window_bounds = array<i64: 512, 48>}, {pipeline_mode = #tpu.pipeline_mode<synchronous>, transform_indices = @transform_1, window_bounds = array<i64: 48, 128>}, {pipeline_mode = #tpu.pipeline_mode<synchronous>, transform_indices = @transform_2, window_bounds = array<i64: 4, 128>}, {pipeline_mode = #tpu.pipeline_mode<synchronous>, transform_indices = @transform_3, window_bounds = array<i64: 64, 128>}, {transform_indices = @transform_4, window_bounds = array<i64: 8, 65, 128>}]} {
    %c0 = arith.constant 0 : index
    %c0_0 = arith.constant 0 : index
    %0 = vector.load %arg1[%c0, %c0_0] : memref<512x48xf32, #tpu.memory_space<vmem>>, vector<512x48xf32>
    %c0_1 = arith.constant 0 : index
    %c0_2 = arith.constant 0 : index
    %1 = vector.load %arg2[%c0_1, %c0_2] : memref<48x128xf32, #tpu.memory_space<vmem>>, vector<48x128xf32>
    %cst = arith.constant dense<0.000000e+00> : vector<512x128xf32>
    %2 = tpu.matmul %0, %1, %cst {dimension_numbers = #tpu.dot_dimension_numbers<[1], [0], [0], [1], [0, 0, 1, 1], [], []>} : vector<512x48xf32>, vector<48x128xf32>, vector<512x128xf32> -> vector<512x128xf32>
    %c0_3 = arith.constant 0 : index
    %c0_4 = arith.constant 0 : index
    %3 = vector.load %arg3[%c0_3, %c0_4] : memref<4x128xf32, #tpu.memory_space<vmem>>, vector<1x128xf32>
    %4 = vector.broadcast %3 : vector<1x128xf32> to vector<512x128xf32>
    %5 = arith.addf %2, %4 : vector<512x128xf32>
    %cst_5 = arith.constant dense<0.000000e+00> : vector<512xf32>
    %6 = vector.multi_reduction <add>, %5, %cst_5 [1] : vector<512x128xf32> to vector<512xf32>
    %7 = vector.shape_cast %6 : vector<512xf32> to vector<512x1xf32>
    %cst_6 = arith.constant 0.020833334 : f32
    %8 = vector.broadcast %cst_6 : f32 to vector<512x1xf32>
    %9 = arith.mulf %7, %8 : vector<512x1xf32>
    %10 = arith.mulf %5, %5 : vector<512x128xf32>
    %cst_7 = arith.constant dense<0.000000e+00> : vector<512xf32>
    %11 = vector.multi_reduction <add>, %10, %cst_7 [1] : vector<512x128xf32> to vector<512xf32>
    %12 = vector.shape_cast %11 : vector<512xf32> to vector<512x1xf32>
    %cst_8 = arith.constant 0.020833334 : f32
    %13 = vector.broadcast %cst_8 : f32 to vector<512x1xf32>
    %14 = arith.mulf %12, %13 : vector<512x1xf32>
    %15 = arith.mulf %9, %9 : vector<512x1xf32>
    %16 = arith.subf %14, %15 : vector<512x1xf32>
    %17 = vector.broadcast %9 : vector<512x1xf32> to vector<512x128xf32>
    %18 = arith.subf %5, %17 : vector<512x128xf32>
    %cst_9 = arith.constant 9.99999974E-6 : f32
    %19 = vector.broadcast %cst_9 : f32 to vector<512x1xf32>
    %20 = arith.addf %16, %19 : vector<512x1xf32>
    %21 = math.rsqrt %20 : vector<512x1xf32>
    %22 = vector.broadcast %21 : vector<512x1xf32> to vector<512x128xf32>
    %23 = arith.mulf %18, %22 : vector<512x128xf32>
    %c1 = arith.constant 1 : index
    %c0_10 = arith.constant 0 : index
    %24 = vector.load %arg3[%c1, %c0_10] : memref<4x128xf32, #tpu.memory_space<vmem>>, vector<1x128xf32>
    %25 = vector.broadcast %24 : vector<1x128xf32> to vector<512x128xf32>
    %26 = arith.mulf %23, %25 : vector<512x128xf32>
    %c2 = arith.constant 2 : index
    %c0_11 = arith.constant 0 : index
    %27 = vector.load %arg3[%c2, %c0_11] : memref<4x128xf32, #tpu.memory_space<vmem>>, vector<1x128xf32>
    %28 = vector.broadcast %27 : vector<1x128xf32> to vector<512x128xf32>
    %29 = arith.addf %26, %28 : vector<512x128xf32>
    %30 = vector.shape_cast %29 : vector<512x128xf32> to vector<8x64x128xf32>
    %c0_12 = arith.constant 0 : index
    %c0_13 = arith.constant 0 : index
    %31 = vector.load %arg4[%c0_12, %c0_13] : memref<64x128xf32, #tpu.memory_space<vmem>>, vector<64x128xf32>
    %32 = vector.shape_cast %31 : vector<64x128xf32> to vector<1x64x128xf32>
    %33 = vector.broadcast %32 : vector<1x64x128xf32> to vector<8x64x128xf32>
    %34 = arith.addf %30, %33 : vector<8x64x128xf32>
    %c0_14 = arith.constant 0 : index
    %c1_15 = arith.constant 1 : index
    %c0_16 = arith.constant 0 : index
    %35 = vector.load %arg5[%c0_14, %c1_15, %c0_16] : memref<8x65x128xf32, #tpu.memory_space<vmem>>, vector<8x64x128xf32>
    tpu.vector_store %arg5[%c0_14, %c1_15, %c0_16], %34 {strides = array<i32>} : memref<8x65x128xf32, #tpu.memory_space<vmem>>, vector<8x64x128xf32>,
    %c3 = arith.constant 3 : index
    %c0_17 = arith.constant 0 : index
    %36 = vector.load %arg3[%c3, %c0_17] : memref<4x128xf32, #tpu.memory_space<vmem>>, vector<1x128xf32>
    %37 = vector.shape_cast %36 : vector<1x128xf32> to vector<1x1x128xf32>
    %38 = vector.shape_cast %37 : vector<1x1x128xf32> to vector<1x1x128xf32>
    %39 = vector.broadcast %38 : vector<1x1x128xf32> to vector<8x1x128xf32>
    %c0_18 = arith.constant 0 : index
    %c0_19 = arith.constant 0 : index
    %c0_20 = arith.constant 0 : index
    %40 = vector.load %arg5[%c0_18, %c0_19, %c0_20] : memref<8x65x128xf32, #tpu.memory_space<vmem>>, vector<8x1x128xf32>
    tpu.vector_store %arg5[%c0_18, %c0_19, %c0_20], %39 {strides = array<i32>} : memref<8x65x128xf32, #tpu.memory_space<vmem>>, vector<8x1x128xf32>,
    return
  }
  func.func @transform_0(%arg0: i32) -> (i32, i32) {
    %c0_i32 = arith.constant 0 : i32
    %c0_i32_0 = arith.constant 0 : i32
    return %arg0, %c0_i32 : i32, i32
  }
  func.func @transform_1(%arg0: i32) -> (i32, i32) {
    %c0_i32 = arith.constant 0 : i32
    %c0_i32_0 = arith.constant 0 : i32
    %c0_i32_1 = arith.constant 0 : i32
    return %c0_i32, %c0_i32_0 : i32, i32
  }
  func.func @transform_2(%arg0: i32) -> (i32, i32) {
    %c0_i32 = arith.constant 0 : i32
    %c0_i32_0 = arith.constant 0 : i32
    %c0_i32_1 = arith.constant 0 : i32
    return %c0_i32, %c0_i32_0 : i32, i32
  }
  func.func @transform_3(%arg0: i32) -> (i32, i32) {
    %c0_i32 = arith.constant 0 : i32
    %c0_i32_0 = arith.constant 0 : i32
    %c0_i32_1 = arith.constant 0 : i32
    return %c0_i32, %c0_i32_0 : i32, i32
  }
  func.func @transform_4(%arg0: i32) -> (i32, i32, i32) {
    %c0_i32 = arith.constant 0 : i32
    %c0_i32_0 = arith.constant 0 : i32
    %c0_i32_1 = arith.constant 0 : i32
    return %arg0, %c0_i32, %c0_i32_0 : i32, i32, i32
  }
}

</mosaic_0001>

<bundles_post_ra>
// kernel: tpu_custom_call.1
= control target key start
LH: loop header
LB: loop body
LE: loop exit
PB: predicated region body
PF: predicated region fallthrough
CT: control target
= control target key end

     0   :  { %s2480_s15 = smov 0   ;;  %s3798_s0 = inlined_call_operand.vmem [shape: f32[1024,48], index: 0, kind: input, shape index: {}]   ;;  %s3799_s1 = inlined_call_operand.vmem [shape: f32[48,128], index: 1, kind: input, shape index: {}]   ;;  %s3800_s2 = inlined_call_operand.vmem [shape: f32[4,128], index: 2, kind: input, shape index: {}]   ;;  %s3801_s3 = inlined_call_operand.vmem [shape: f32[64,128], index: 3, kind: input, shape index: {}]   ;;  %s3802_s4 = inlined_call_operand.vmem [shape: f32[16,65,128], index: 4, kind: output, shape index: {}]  }
   0x1 LB: > { %s2029_s16 = sadd.s32 4294967295, %s2453_s15   ;;  %p2033_p0 = scmp.ge.s32.totalorder %s2453_s15, 1  ;;  %s2453_s15 = sphi %s2480_s15, %s14_s15  }
   0x2   : > { %p163_p1 = scmp.lt.s32.totalorder %s2453_s15, 3 }
   0x4   : > { %p164_p2 = pnand %p2033_p0, %p163_p1 }
   0x6   : > { %167 = sbr.rel (%p164_p2) target bundleno = 640 (0x280), region = 36 }
   0xb   : > { %v272_v0 = vld [vmem:[%s3799_s1 + $0x28] sm:$0xff]  ;;  %v271_v1 = vld [vmem:[%s3799_s1 + $0x20] sm:$0xff]  ;;  %s2034_s21 = sshll.u32 %s2029_s16, 6  ;;  %v270_v2 = vld [vmem:[%s3799_s1 + $0x18] sm:$0xff]  ;;  %vm278_vm0 = vcmask 392192   ;;  %s2036_s10 = sshll.u32 %s2029_s16, 3 }
   0xc   : > { %2177 = vmatprep.subr.mxu0 %v272_v0  ;;  %2285 = vmatprep.subr.mxu1 %v272_v0  ;;  %p191_p3 = scmp.lt.s32.totalorder %s2034_s21, 127  ;;  %v269_v3 = vld [vmem:[%s3799_s1 + $0x10] sm:$0xff]  ;;  %v268_v4 = vld [vmem:[%s3799_s1 + $0x8] sm:$0xff]  ;;  %v267_v5 = vld [vmem:[%s3799_s1] sm:$0xff]  ;;  %p197_p4 = scmp.lt.s32.totalorder %s2036_s10, 15 }
   0xd   : > { %2178 = vmatpush3.msra.mxu0 %v272_v0  ;;  %2291 = vmatpush3.msra.mxu1 %v272_v0 }
   0xe   : > { %2179 = vmatprep.subr.mxu0 %v271_v1  ;;  %2286 = vmatprep.subr.mxu1 %v271_v1  ;;  %s3852_s21 = smov (!%p191_p3, %s2034_s21), 127  ;;  %s3854_s10 = smov (!%p197_p4, %s2036_s10), 15 }
   0xf   : > { %2180 = vmatpush3.msra.mxu0 %v271_v1  ;;  %2292 = vmatpush3.msra.mxu1 %v271_v1  ;;  %s2035_s26 = sshll.u32 %s3852_s21, 3  ;;  %s2297_s16 = smul.u32 72, %s3854_s10 }
  0x10   : > { %2181 = vmatprep.subr.mxu0 %v270_v2  ;;  %2287 = vmatprep.subr.mxu1 %v270_v2  ;;  %s2508_s5 = scalar_lea.vmem %s3798_s0, %s2035_s26 }
  0x11   : > { %2182 = vmatpush3.msra.mxu0 %v270_v2  ;;  %2293 = vmatpush3.msra.mxu1 %v270_v2  ;;  %v203_v6 = vld [vmem:[%s2508_s5] sm:$0xff]  ;;  %v204_v8 = vld [vmem:[%s2508_s5 + $0x8] sm:$0xff]  ;;  %v205_v10 = vld [vmem:[%s2508_s5 + $0x10] sm:$0xff]  ;;  %s2964_s21 = scalar_lea.vmem %s3802_s4, %s2297_s16 }
  0x12   : > { %2183 = vmatprep.subr.mxu0 %v269_v3  ;;  %2288 = vmatprep.subr.mxu1 %v269_v3  ;;  %v235_v7 = vld [vmem:[%s2508_s5 + $0x100] sm:$0xff]  ;;  %v236_v9 = vld [vmem:[%s2508_s5 + $0x108] sm:$0xff]  ;;  %v237_v11 = vld [vmem:[%s2508_s5 + $0x110] sm:$0xff] }
  0x13   : > { %2184 = vmatpush3.msra.mxu0 %v269_v3  ;;  %2294 = vmatpush3.msra.mxu1 %v269_v3  ;;  %v206_v12 = vld [vmem:[%s2508_s5 + $0x18] sm:$0xff]  ;;  %v207_v14 = vld [vmem:[%s2508_s5 + $0x20] sm:$0xff]  ;;  %v208_v16 = vld [vmem:[%s2508_s5 + $0x28] sm:$0xff] }
  0x14   : > { %2185 = vmatprep.subr.mxu0 %v268_v4  ;;  %2289 = vmatprep.subr.mxu1 %v268_v4  ;;  %v238_v13 = vld [vmem:[%s2508_s5 + $0x118] sm:$0xff]  ;;  %v239_v15 = vld [vmem:[%s2508_s5 + $0x120] sm:$0xff]  ;;  %v240_v17 = vld [vmem:[%s2508_s5 + $0x128] sm:$0xff] }
  0x15   : > { %2186 = vmatpush3.msra.mxu0 %v268_v4  ;;  %2295 = vmatpush3.msra.mxu1 %v268_v4  ;;  %v209_v18 = vld [vmem:[%s2508_s5 + $0x30] sm:$0xff]  ;;  %v210_v20 = vld [vmem:[%s2508_s5 + $0x38] sm:$0xff]  ;;  %v211_v22 = vld [vmem:[%s2508_s5 + $0x40] sm:$0xff] }
  0x16   : > { %2187 = vmatprep.subr.mxu0 %v267_v5  ;;  %2290 = vmatprep.subr.mxu1 %v267_v5  ;;  %v241_v19 = vld [vmem:[%s2508_s5 + $0x130] sm:$0xff]  ;;  %v242_v21 = vld [vmem:[%s2508_s5 + $0x138] sm:$0xff]  ;;  %v243_v23 = vld [vmem:[%s2508_s5 + $0x140] sm:$0xff] }
  0x17   : > { %2188 = vmatpush3.msra.mxu0 %v267_v5  ;;  %2296 = vmatpush3.msra.mxu1 %v267_v5  ;;  %v212_v24 = vld [vmem:[%s2508_s5 + $0x48] sm:$0xff]  ;;  %v213_v26 = vld [vmem:[%s2508_s5 + $0x50] sm:$0xff]  ;;  %v214_v28 = vld [vmem:[%s2508_s5 + $0x58] sm:$0xff] }
  0x18   : > { %2189 = vmatprep.mubr.msk.f32.mxu0 %vm278_vm0, %v203_v6  ;;  %2237 = vmatprep.mubr.msk.f32.mxu1 %vm278_vm0, %v235_v7  ;;  %v244_v25 = vld [vmem:[%s2508_s5 + $0x148] sm:$0xff]  ;;  %v245_v27 = vld [vmem:[%s2508_s5 + $0x150] sm:$0xff]  ;;  %v246_v29 = vld [vmem:[%s2508_s5 + $0x158] sm:$0xff] }
  0x19   : > { %2190 = vmatmul.mubr.msk.f32.vlgmr.msra.gmra.mxu0 %vm278_vm0, %v204_v8  ;;  %2238 = vmatmul.mubr.msk.f32.vlgmr.msra.gmra.mxu1 %vm278_vm0, %v236_v9  ;;  %v215_v30 = vld [vmem:[%s2508_s5 + $0x60] sm:$0xff]  ;;  %v216_v32 = vld [vmem:[%s2508_s5 + $0x68] sm:$0xff]  ;;  %v217_v34 = vld [vmem:[%s2508_s5 + $0x70] sm:$0xff] }
  0x1a   : > { %2192 = vmatprep.mubr.msk.f32.mxu0 %vm278_vm0, %v205_v10  ;;  %2240 = vmatprep.mubr.msk.f32.mxu1 %vm278_vm0, %v237_v11  ;;  %v247_v31 = vld [vmem:[%s2508_s5 + $0x160] sm:$0xff]  ;;  %v248_v33 = vld [vmem:[%s2508_s5 + $0x168] sm:$0xff]  ;;  %v249_v35 = vld [vmem:[%s2508_s5 + $0x170] sm:$0xff] }
  0x1b   : > { %v218_v36 = vld [vmem:[%s2508_s5 + $0x78] sm:$0xff]  ;;  %v219_v38 = vld [vmem:[%s2508_s5 + $0x80] sm:$0xff]  ;;  %v220_v40 = vld [vmem:[%s2508_s5 + $0x88] sm:$0xff] }
  0x1c   : > { %v250_v37 = vld [vmem:[%s2508_s5 + $0x178] sm:$0xff]  ;;  %v251_v39 = vld [vmem:[%s2508_s5 + $0x180] sm:$0xff]  ;;  %v252_v41 = vld [vmem:[%s2508_s5 + $0x188] sm:$0xff] }
  0x1d   : > { %2193 = vmatmul.mubr.msk.f32.gmra.mxu0 %vm278_vm0, %v206_v12  ;;  %2241 = vmatmul.mubr.msk.f32.gmra.mxu1 %vm278_vm0, %v238_v13  ;;  %v221_v42 = vld [vmem:[%s2508_s5 + $0x90] sm:$0xff]  ;;  %v222_v44 = vld [vmem:[%s2508_s5 + $0x98] sm:$0xff]  ;;  %v223_v46 = vld [vmem:[%s2508_s5 + $0xa0] sm:$0xff] }
  0x1e   : > { %2195 = vmatprep.mubr.msk.f32.mxu0 %vm278_vm0, %v207_v14  ;;  %2243 = vmatprep.mubr.msk.f32.mxu1 %vm278_vm0, %v239_v15  ;;  %v253_v43 = vld [vmem:[%s2508_s5 + $0x190] sm:$0xff]  ;;  %v254_v45 = vld [vmem:[%s2508_s5 + $0x198] sm:$0xff]  ;;  %v255_v47 = vld [vmem:[%s2508_s5 + $0x1a0] sm:$0xff] }
  0x1f   : > { %v224_v48 = vld [vmem:[%s2508_s5 + $0xa8] sm:$0xff]  ;;  %v225_v50 = vld [vmem:[%s2508_s5 + $0xb0] sm:$0xff]  ;;  %v226_v52 = vld [vmem:[%s2508_s5 + $0xb8] sm:$0xff] }
  0x20   : > { %v256_v49 = vld [vmem:[%s2508_s5 + $0x1a8] sm:$0xff]  ;;  %v257_v51 = vld [vmem:[%s2508_s5 + $0x1b0] sm:$0xff]  ;;  %v258_v53 = vld [vmem:[%s2508_s5 + $0x1b8] sm:$0xff] }
  0x21   : > { %2196 = vmatmul.mubr.msk.f32.gmra.mxu0 %vm278_vm0, %v208_v16  ;;  %2244 = vmatmul.mubr.msk.f32.gmra.mxu1 %vm278_vm0, %v240_v17  ;;  %v227_v54 = vld [vmem:[%s2508_s5 + $0xc0] sm:$0xff]  ;;  %v228_v56 = vld [vmem:[%s2508_s5 + $0xc8] sm:$0xff]  ;;  %v229_v58 = vld [vmem:[%s2508_s5 + $0xd0] sm:$0xff] }
  0x22   : > { %2198 = vmatprep.mubr.msk.f32.mxu0 %vm278_vm0, %v209_v18  ;;  %2246 = vmatprep.mubr.msk.f32.mxu1 %vm278_vm0, %v241_v19  ;;  %v259_v55 = vld [vmem:[%s2508_s5 + $0x1c0] sm:$0xff]  ;;  %v260_v57 = vld [vmem:[%s2508_s5 + $0x1c8] sm:$0xff]  ;;  %v230_v59 = vld [vmem:[%s2508_s5 + $0xd8] sm:$0xff] }
  0x23   : > { %v261_v60 = vld [vmem:[%s2508_s5 + $0x1d0] sm:$0xff]  ;;  %v262_v61 = vld [vmem:[%s2508_s5 + $0x1d8] sm:$0xff]  ;;  %v231_v62 = vld [vmem:[%s2508_s5 + $0xe0] sm:$0xff] }
  0x24   : > { %v232_v63 = vld [vmem:[%s2508_s5 + $0xe8] sm:$0xff]  ;;  %v263_v0 = vld [vmem:[%s2508_s5 + $0x1e0] sm:$0xff]  ;;  %v233_v2 = vld [vmem:[%s2508_s5 + $0xf0] sm:$0xff] }
  0x25   : > { %2199 = vmatmul.mubr.msk.f32.gmra.mxu0 %vm278_vm0, %v210_v20  ;;  %2247 = vmatmul.mubr.msk.f32.gmra.mxu1 %vm278_vm0, %v242_v21  ;;  %v264_v1 = vld [vmem:[%s2508_s5 + $0x1e8] sm:$0xff]  ;;  %v234_v3 = vld [vmem:[%s2508_s5 + $0xf8] sm:$0xff]  ;;  %v265_v4 = vld [vmem:[%s2508_s5 + $0x1f0] sm:$0xff] }
  0x26   : > { %2201 = vmatprep.mubr.msk.f32.mxu0 %vm278_vm0, %v211_v22  ;;  %2249 = vmatprep.mubr.msk.f32.mxu1 %vm278_vm0, %v243_v23  ;;  %v266_v5 = vld [vmem:[%s2508_s5 + $0x1f8] sm:$0xff]  ;;  %v2644_v6 = vld [vmem:[%s3800_s2] ss:$0 sm:$0xff] }
  0x29   : > { %2202 = vmatmul.mubr.msk.f32.gmra.mxu0 %vm278_vm0, %v212_v24  ;;  %2250 = vmatmul.mubr.msk.f32.gmra.mxu1 %vm278_vm0, %v244_v25 }
  0x2a   : > { %2204 = vmatprep.mubr.msk.f32.mxu0 %vm278_vm0, %v213_v26  ;;  %2252 = vmatprep.mubr.msk.f32.mxu1 %vm278_vm0, %v245_v27 }
  0x2d   : > { %2205 = vmatmul.mubr.msk.f32.gmra.mxu0 %vm278_vm0, %v214_v28  ;;  %2253 = vmatmul.mubr.msk.f32.gmra.mxu1 %vm278_vm0, %v246_v29 }
  0x2e   : > { %2207 = vmatprep.mubr.msk.f32.mxu0 %vm278_vm0, %v215_v30  ;;  %2255 = vmatprep.mubr.msk.f32.mxu1 %vm278_vm0, %v247_v31 }
  0x31   : > { %2208 = vmatmul.mubr.msk.f32.gmra.mxu0 %vm278_vm0, %v216_v32  ;;  %2256 = vmatmul.mubr.msk.f32.gmra.mxu1 %vm278_vm0, %v248_v33 }
  0x32   : > { %2210 = vmatprep.mubr.msk.f32.mxu0 %vm278_vm0, %v217_v34  ;;  %2258 = vmatprep.mubr.msk.f32.mxu1 %vm278_vm0, %v249_v35 }
  0x35   : > { %2211 = vmatmul.mubr.msk.f32.gmra.mxu0 %vm278_vm0, %v218_v36  ;;  %2259 = vmatmul.mubr.msk.f32.gmra.mxu1 %vm278_vm0, %v250_v37 }
  0x36   : > { %2213 = vmatprep.mubr.msk.f32.mxu0 %vm278_vm0, %v219_v38  ;;  %2261 = vmatprep.mubr.msk.f32.mxu1 %vm278_vm0, %v251_v39 }
  0x39   : > { %2214 = vmatmul.mubr.msk.f32.gmra.mxu0 %vm278_vm0, %v220_v40  ;;  %2262 = vmatmul.mubr.msk.f32.gmra.mxu1 %vm278_vm0, %v252_v41 }
  0x3a   : > { %2216 = vmatprep.mubr.msk.f32.mxu0 %vm278_vm0, %v221_v42  ;;  %2264 = vmatprep.mubr.msk.f32.mxu1 %vm278_vm0, %v253_v43 }
  0x3d   : > { %2217 = vmatmul.mubr.msk.f32.gmra.mxu0 %vm278_vm0, %v222_v44  ;;  %2265 = vmatmul.mubr.msk.f32.gmra.mxu1 %vm278_vm0, %v254_v45 }
  0x3e   : > { %2219 = vmatprep.mubr.msk.f32.mxu0 %vm278_vm0, %v223_v46  ;;  %2267 = vmatprep.mubr.msk.f32.mxu1 %vm278_vm0, %v255_v47 }
  0x41   : > { %2220 = vmatmul.mubr.msk.f32.gmra.mxu0 %vm278_vm0, %v224_v48  ;;  %2268 = vmatmul.mubr.msk.f32.gmra.mxu1 %vm278_vm0, %v256_v49 }
  0x42   : > { %2222 = vmatprep.mubr.msk.f32.mxu0 %vm278_vm0, %v225_v50  ;;  %2270 = vmatprep.mubr.msk.f32.mxu1 %vm278_vm0, %v257_v51 }
  0x45   : > { %2223 = vmatmul.mubr.msk.f32.gmra.mxu0 %vm278_vm0, %v226_v52  ;;  %2271 = vmatmul.mubr.msk.f32.gmra.mxu1 %vm278_vm0, %v258_v53 }
  0x46   : > { %2225 = vmatprep.mubr.msk.f32.mxu0 %vm278_vm0, %v227_v54  ;;  %2273 = vmatprep.mubr.msk.f32.mxu1 %vm278_vm0, %v259_v55 }
  0x49   : > { %2226 = vmatmul.mubr.msk.f32.gmra.mxu0 %vm278_vm0, %v228_v56  ;;  %2274 = vmatmul.mubr.msk.f32.gmra.mxu1 %vm278_vm0, %v260_v57 }
  0x4a   : > { %2228 = vmatprep.mubr.msk.f32.mxu0 %vm278_vm0, %v229_v58  ;;  %2276 = vmatprep.mubr.msk.f32.mxu1 %vm278_vm0, %v261_v60 }
  0x4d   : > { %2229 = vmatmul.mubr.msk.f32.gmra.mxu0 %vm278_vm0, %v230_v59  ;;  %2277 = vmatmul.mubr.msk.f32.gmra.mxu1 %vm278_vm0, %v262_v61 }
  0x4e   : > { %2231 = vmatprep.mubr.msk.f32.mxu0 %vm278_vm0, %v231_v62  ;;  %2279 = vmatprep.mubr.msk.f32.mxu1 %vm278_vm0, %v263_v0 }
  0x51   : > { %2232 = vmatmul.mubr.msk.f32.gmra.mxu0 %vm278_vm0, %v232_v63  ;;  %2280 = vmatmul.mubr.msk.f32.gmra.mxu1 %vm278_vm0, %v264_v1 }
  0x52   : > { %2234 = vmatprep.mubr.msk.f32.mxu0 %vm278_vm0, %v233_v2  ;;  %2282 = vmatprep.mubr.msk.f32.mxu1 %vm278_vm0, %v265_v4 }
  0x55   : > { %2235 = vmatmul.mubr.msk.f32.gmra.mxu0 %vm278_vm0, %v234_v3  ;;  %2283 = vmatmul.mubr.msk.f32.gmra.mxu1 %vm278_vm0, %v266_v5 }
  0xd9   : > { %v2191_v7 = vpop.f32.mrf.mxu0  ;;  %v2239_v8 = vpop.f32.mrf.mxu1 }
  0xda   : > { %v2647_v9 = vadd.f32 %v2191_v7, %v2644_v6  ;;  %v2650_v10 = vadd.f32 %v2239_v8, %v2644_v6 }
  0xdb   : > { %v537_v11 = vpop.f32.mrf.mxu0  ;;  %v697_v14 = vpop.f32.mrf.mxu1 }
  0xdc   : > { %922 = vadd.xlane.f32.xlu1 %v2650_v10  ;;  %858 = vadd.xlane.f32.xlu0 %v2647_v9  ;;  %v2655_v12 = vadd.f32 %v2644_v6, %v537_v11  ;;  %v1049_v13 = vmul.f32 %v2647_v9, %v2647_v9  ;;  %v2661_v15 = vadd.f32 %v2644_v6, %v697_v14 }
  0xdd   : > { %v1081_v16 = vmul.f32 %v2650_v10, %v2650_v10  ;;  %v2194_v17 = vpop.f32.mrf.mxu0  ;;  %v2242_v20 = vpop.f32.mrf.mxu1 }
  0xde   : > { %v2666_v18 = vadd.f32 %v2194_v17, %v2644_v6  ;;  %v1048_v19 = vmul.f32 %v2655_v12, %v2655_v12  ;;  %v2672_v21 = vadd.f32 %v2242_v20, %v2644_v6  ;;  %v1080_v22 = vmul.f32 %v2661_v15, %v2661_v15 }
  0xdf   : > { %v547_v23 = vpop.f32.mrf.mxu0  ;;  %v707_v24 = vpop.f32.mrf.mxu1 }
  0xe0   : > { %1114 = vadd.xlane.f32.xlu1 %v1049_v13  ;;  %856 = vadd.xlane.f32.xlu0 %v2655_v12  ;;  %v2679_v25 = vadd.f32 %v2644_v6, %v547_v23  ;;  %v2682_v26 = vadd.f32 %v2644_v6, %v707_v24  ;;  %v1051_v27 = vmul.f32 %v2666_v18, %v2666_v18 }
  0xe1   : > { %v2197_v29 = vpop.f32.mrf.mxu0  ;;  %v1083_v30 = vmul.f32 %v2672_v21, %v2672_v21  ;;  %v2245_v33 = vpop.f32.mrf.mxu1 }
  0xe2   : > { %v1050_v28 = vmul.f32 %v2679_v25, %v2679_v25  ;;  %v1082_v31 = vmul.f32 %v2682_v26, %v2682_v26  ;;  %v2695_v34 = vadd.f32 %v2197_v29, %v2644_v6  ;;  %v2703_v37 = vadd.f32 %v2245_v33, %v2644_v6 }
  0xe3   : > { %v557_v32 = vpop.f32.mrf.mxu0  ;;  %v717_v36 = vpop.f32.mrf.mxu1 }
  0xe4   : > { %1178 = vadd.xlane.f32.xlu1 %v1081_v16  ;;  %920 = vadd.xlane.f32.xlu0 %v2661_v15  ;;  %v2698_v35 = vadd.f32 %v2644_v6, %v557_v32  ;;  %v2706_v38 = vadd.f32 %v2644_v6, %v717_v36  ;;  %v1053_v39 = vmul.f32 %v2695_v34, %v2695_v34 }
  0xe5   : > { %v2200_v41 = vpop.f32.mrf.mxu0  ;;  %v1085_v42 = vmul.f32 %v2703_v37, %v2703_v37  ;;  %v2248_v45 = vpop.f32.mrf.mxu1 }
  0xe6   : > { %v1052_v40 = vmul.f32 %v2698_v35, %v2698_v35  ;;  %v1084_v43 = vmul.f32 %v2706_v38, %v2706_v38  ;;  %v2719_v46 = vadd.f32 %v2200_v41, %v2644_v6  ;;  %v2727_v49 = vadd.f32 %v2248_v45, %v2644_v6 }
  0xe7   : > { %v567_v44 = vpop.f32.mrf.mxu0  ;;  %v727_v48 = vpop.f32.mrf.mxu1 }
  0xe8   : > { %862 = vadd.xlane.f32.xlu1 %v2666_v18  ;;  %1112 = vadd.xlane.f32.xlu0 %v1048_v19  ;;  %v2722_v47 = vadd.f32 %v2644_v6, %v567_v44  ;;  %v2730_v50 = vadd.f32 %v2644_v6, %v727_v48  ;;  %v1055_v51 = vmul.f32 %v2719_v46, %v2719_v46 }
  0xe9   : > { %v2203_v53 = vpop.f32.mrf.mxu0  ;;  %v1087_v54 = vmul.f32 %v2727_v49, %v2727_v49  ;;  %v2251_v57 = vpop.f32.mrf.mxu1 }
  0xea   : > { %v1054_v52 = vmul.f32 %v2722_v47, %v2722_v47  ;;  %v1086_v55 = vmul.f32 %v2730_v50, %v2730_v50  ;;  %v2743_v58 = vadd.f32 %v2203_v53, %v2644_v6  ;;  %v2751_v61 = vadd.f32 %v2251_v57, %v2644_v6 }
  0xeb   : > { %v577_v56 = vpop.f32.mrf.mxu0  ;;  %v737_v60 = vpop.f32.mrf.mxu1 }
  0xec   : > { %926 = vadd.xlane.f32.xlu1 %v2672_v21  ;;  %1176 = vadd.xlane.f32.xlu0 %v1080_v22  ;;  %v2746_v59 = vadd.f32 %v2644_v6, %v577_v56  ;;  %v2754_v62 = vadd.f32 %v2644_v6, %v737_v60  ;;  %v1057_v63 = vmul.f32 %v2743_v58, %v2743_v58 }
  0xed   : > { %v2206_v1 = vpop.f32.mrf.mxu0  ;;  %v1089_v2 = vmul.f32 %v2751_v61, %v2751_v61  ;;  %v2254_v5 = vpop.f32.mrf.mxu1 }
  0xee   : > { %v1056_v0 = vmul.f32 %v2746_v59, %v2746_v59  ;;  %v1088_v3 = vmul.f32 %v2754_v62, %v2754_v62  ;;  %v2767_v7 = vadd.f32 %v2206_v1, %v2644_v6  ;;  %v2775_v13 = vadd.f32 %v2254_v5, %v2644_v6 }
  0xef   : > { %v587_v4 = vpop.f32.mrf.mxu0  ;;  %v747_v11 = vpop.f32.mrf.mxu1 }
  0xf0   : > { %860 = vadd.xlane.f32.xlu1 %v2679_v25  ;;  %924 = vadd.xlane.f32.xlu0 %v2682_v26  ;;  %v2770_v8 = vadd.f32 %v2644_v6, %v587_v4  ;;  %v2778_v14 = vadd.f32 %v2644_v6, %v747_v11  ;;  %v1059_v16 = vmul.f32 %v2767_v7, %v2767_v7 }
  0xf1   : > { %v2209_v19 = vpop.f32.mrf.mxu0  ;;  %v1091_v20 = vmul.f32 %v2775_v13, %v2775_v13  ;;  %v2257_v24 = vpop.f32.mrf.mxu1 }
  0xf2   : > { %v1058_v17 = vmul.f32 %v2770_v8, %v2770_v8  ;;  %v1090_v22 = vmul.f32 %v2778_v14, %v2778_v14 }
  0xf3   : > { %v597_v23 = vpop.f32.mrf.mxu0  ;;  %v757_v29 = vpop.f32.mrf.mxu1 }
  0xf4   : > { %1118 = vadd.xlane.f32.xlu1 %v1051_v27  ;;  %1116 = vadd.xlane.f32.xlu0 %v1050_v28  ;;  %v2791_v27 = vadd.f32 %v2209_v19, %v2644_v6  ;;  %v2794_v28 = vadd.f32 %v2644_v6, %v597_v23 }
  0xf5   : > { %v2212_v36 = vpop.f32.mrf.mxu0 }
  0xf6   : > { %v1061_v32 = vmul.f32 %v2791_v27, %v2791_v27  ;;  %v1060_v33 = vmul.f32 %v2794_v28, %v2794_v28 }
  0xf7   : > { %v607_v41 = vpop.f32.mrf.mxu0 }
  0xf8   : > { %1182 = vadd.xlane.f32.xlu1 %v1083_v30  ;;  %1180 = vadd.xlane.f32.xlu0 %v1082_v31  ;;  %v2799_v30 = vadd.f32 %v2257_v24, %v2644_v6  ;;  %v2802_v31 = vadd.f32 %v2644_v6, %v757_v29  ;;  %v2818_v44 = vadd.f32 %v2644_v6, %v607_v41 }
  0xfa   : > { %v1062_v53 = vmul.f32 %v2818_v44, %v2818_v44 }
  0xfc   : > { %866 = vadd.xlane.f32.xlu1 %v2695_v34  ;;  %864 = vadd.xlane.f32.xlu0 %v2698_v35 }
 0x100   : > { %930 = vadd.xlane.f32.xlu1 %v2703_v37  ;;  %928 = vadd.xlane.f32.xlu0 %v2706_v38 }
 0x104   : > { %1122 = vadd.xlane.f32.xlu1 %v1053_v39  ;;  %1120 = vadd.xlane.f32.xlu0 %v1052_v40  ;;  %v1093_v39 = vmul.f32 %v2799_v30, %v2799_v30  ;;  %v1092_v40 = vmul.f32 %v2802_v31, %v2802_v31 }
 0x108   : > { %1186 = vadd.xlane.f32.xlu1 %v1085_v42  ;;  %1184 = vadd.xlane.f32.xlu0 %v1084_v43  ;;  %v2260_v42 = vpop.f32.mrf.mxu1  ;;  %v2815_v43 = vadd.f32 %v2212_v36, %v2644_v6 }
 0x109   : > { %v2823_v48 = vadd.f32 %v2260_v42, %v2644_v6 }
 0x10a   : > { %v767_v45 = vpop.f32.mrf.mxu1 }
 0x10c   : > { %870 = vadd.xlane.f32.xlu1 %v2719_v46  ;;  %868 = vadd.xlane.f32.xlu0 %v2722_v47  ;;  %v2263_v60 = vpop.f32.mrf.mxu1 }
 0x10e   : > { %v777_v1 = vpop.f32.mrf.mxu1 }
 0x110   : > { %934 = vadd.xlane.f32.xlu1 %v2727_v49  ;;  %932 = vadd.xlane.f32.xlu0 %v2730_v50  ;;  %v2266_v24 = vpop.f32.mrf.mxu1 }
 0x114   : > { %1126 = vadd.xlane.f32.xlu1 %v1055_v51  ;;  %1124 = vadd.xlane.f32.xlu0 %v1054_v52  ;;  %v2826_v51 = vadd.f32 %v2644_v6, %v767_v45  ;;  %v1063_v52 = vmul.f32 %v2815_v43, %v2815_v43  ;;  %v787_v45 = vpop.f32.mrf.mxu1 }
 0x116   : > { %v1094_v56 = vmul.f32 %v2826_v51, %v2826_v51 }
 0x118   : > { %1190 = vadd.xlane.f32.xlu1 %v1087_v54  ;;  %1188 = vadd.xlane.f32.xlu0 %v1086_v55  ;;  %v2215_v54 = vpop.f32.mrf.mxu0  ;;  %v1095_v55 = vmul.f32 %v2823_v48, %v2823_v48 }
 0x11a   : > { %v617_v57 = vpop.f32.mrf.mxu0 }
 0x11c   : > { %874 = vadd.xlane.f32.xlu1 %v2743_v58  ;;  %872 = vadd.xlane.f32.xlu0 %v2746_v59  ;;  %v2218_v11 = vpop.f32.mrf.mxu0 }
 0x11e   : > { %v627_v23 = vpop.f32.mrf.mxu0 }
 0x11f   : > { %v2872_v41 = vadd.f32 %v2644_v6, %v627_v23 }
 0x120   : > { %938 = vadd.xlane.f32.xlu1 %v2751_v61  ;;  %936 = vadd.xlane.f32.xlu0 %v2754_v62 }
 0x121   : > { %3823 = vst [vmem:[#allocation6_spill] sm:$0xff] %v2872_v41 }
 0x124   : > { %1130 = vadd.xlane.f32.xlu1 %v1057_v63  ;;  %1128 = vadd.xlane.f32.xlu0 %v1056_v0  ;;  %v2839_v63 = vadd.f32 %v2215_v54, %v2644_v6  ;;  %v2842_v0 = vadd.f32 %v2644_v6, %v617_v57 }
 0x126   : > { %3819 = vst [vmem:[#allocation2_spill] sm:$0xff] %v2842_v0  ;;  %v1065_v4 = vmul.f32 %v2839_v63, %v2839_v63  ;;  %v1064_v5 = vmul.f32 %v2842_v0, %v2842_v0 }
 0x128   : > { %1194 = vadd.xlane.f32.xlu1 %v1089_v2  ;;  %1192 = vadd.xlane.f32.xlu0 %v1088_v3  ;;  %v2847_v2 = vadd.f32 %v2263_v60, %v2644_v6  ;;  %v2850_v3 = vadd.f32 %v2644_v6, %v777_v1  ;;  %v2884_v1 = vadd.f32 %v2644_v6, %v787_v45 }
 0x12a   : > { %3820 = vst [vmem:[#allocation3_spill] sm:$0xff] %v2847_v2  ;;  %3821 = vst [vmem:[#allocation4_spill] sm:$0xff] %v2850_v3 }
 0x12b   : > { %3825 = vst [vmem:[#allocation8_spill] sm:$0xff] %v2884_v1 }
 0x12c   : > { %878 = vadd.xlane.f32.xlu1 %v2767_v7  ;;  %876 = vadd.xlane.f32.xlu0 %v2770_v8 }
 0x130   : > { %942 = vadd.xlane.f32.xlu1 %v2775_v13  ;;  %940 = vadd.xlane.f32.xlu0 %v2778_v14 }
 0x134   : > { %1134 = vadd.xlane.f32.xlu1 %v1059_v16  ;;  %1132 = vadd.xlane.f32.xlu0 %v1058_v17 }
 0x138   : > { %1198 = vadd.xlane.f32.xlu1 %v1091_v20  ;;  %1196 = vadd.xlane.f32.xlu0 %v1090_v22  ;;  %v1097_v20 = vmul.f32 %v2847_v2, %v2847_v2  ;;  %v1096_v22 = vmul.f32 %v2850_v3, %v2850_v3 }
 0x13c   : > { %882 = vadd.xlane.f32.xlu1 %v2791_v27  ;;  %880 = vadd.xlane.f32.xlu0 %v2794_v28 }
 0x140   : > { %946 = vadd.xlane.f32.xlu1 %v2799_v30  ;;  %944 = vadd.xlane.f32.xlu0 %v2802_v31 }
 0x144   : > { %1138 = vadd.xlane.f32.xlu1 %v1061_v32  ;;  %1136 = vadd.xlane.f32.xlu0 %v1060_v33 }
 0x148   : > { %1202 = vadd.xlane.f32.xlu1 %v1093_v39  ;;  %1200 = vadd.xlane.f32.xlu0 %v1092_v40  ;;  %v2869_v39 = vadd.f32 %v2218_v11, %v2644_v6 }
 0x14a   : > { %3822 = vst [vmem:[#allocation5_spill] sm:$0xff] %v2869_v39 }
 0x14c   : > { %886 = vadd.xlane.f32.xlu1 %v2815_v43  ;;  %884 = vadd.xlane.f32.xlu0 %v2818_v44 }
 0x150   : > { %950 = vadd.xlane.f32.xlu1 %v2823_v48  ;;  %948 = vadd.xlane.f32.xlu0 %v2826_v51 }
 0x154   : > { %1142 = vadd.xlane.f32.xlu1 %v1063_v52  ;;  %1140 = vadd.xlane.f32.xlu0 %v1062_v53  ;;  %v2876_v52 = vadd.f32 %v2266_v24, %v2644_v6  ;;  %v1066_v24 = vmul.f32 %v2872_v41, %v2872_v41 }
 0x156   : > { %3824 = vst [vmem:[#allocation7_spill] sm:$0xff] %v2876_v52 }
 0x158   : > { %1206 = vadd.xlane.f32.xlu1 %v1095_v55  ;;  %1204 = vadd.xlane.f32.xlu0 %v1094_v56 }
 0x15c   : > { %890 = vadd.xlane.f32.xlu1 %v2839_v63  ;;  %888 = vadd.xlane.f32.xlu0 %v2842_v0 }
 0x160   : > { %954 = vadd.xlane.f32.xlu1 %v2847_v2  ;;  %952 = vadd.xlane.f32.xlu0 %v2850_v3 }
 0x164   : > { %1146 = vadd.xlane.f32.xlu1 %v1065_v4  ;;  %1144 = vadd.xlane.f32.xlu0 %v1064_v5 }
 0x165   : > { %v923_v16 = vpop.xlane.xlu1 %922  ;;  %v859_v17 = vpop.xlane.xlu0 %858 }
 0x166   : > { %v2858_v19 = vmul.f32 0.020833334, %v859_v17  ;;  %v2864_v33 = vmul.f32 0.020833334, %v923_v16  ;;  %v1067_v16 = vmul.f32 %v2869_v39, %v2869_v39 }
 0x168   : > { %1210 = vadd.xlane.f32.xlu1 %v1097_v20  ;;  %1208 = vadd.xlane.f32.xlu0 %v1096_v22  ;;  %v1305_v36 = vmul.f32 %v2858_v19, %v2858_v19  ;;  %v1337_v55 = vmul.f32 %v2864_v33, %v2864_v33 }
 0x169   : > { %v1115_v29 = vpop.xlane.xlu1 %1114  ;;  %v857_v32 = vpop.xlane.xlu0 %856 }
 0x16a   : > { %v1241_v40 = vmul.f32 0.020833334, %v1115_v29  ;;  %v2881_v57 = vmul.f32 0.020833334, %v857_v32  ;;  %v2221_v32 = vpop.f32.mrf.mxu0 }
 0x16c   : > { %v1369_v42 = vsub.f32 %v1241_v40, %v1305_v36  ;;  %894 = vadd.xlane.f32.xlu1 %v2869_v39  ;;  %892 = vadd.xlane.f32.xlu0 %v2872_v41  ;;  %v1304_v17 = vmul.f32 %v2881_v57, %v2881_v57 }
 0x16d   : > { %v1179_v53 = vpop.xlane.xlu1 %1178  ;;  %v921_v54 = vpop.xlane.xlu0 %920 }
 0x16e   : > { %v1497_v56 = vadd.f32 1e-05, %v1369_v42  ;;  %v1273_v60 = vmul.f32 0.020833334, %v1179_v53  ;;  %v2892_v22 = vmul.f32 0.020833334, %v921_v54  ;;  %v1099_v54 = vmul.f32 %v2876_v52, %v2876_v52 }
 0x170   : > { %2306 = vrsqrt.f32 %v1497_v56  ;;  %v1401_v4 = vsub.f32 %v1273_v60, %v1337_v55  ;;  %958 = vadd.xlane.f32.xlu1 %v2876_v52  ;;  %956 = vadd.xlane.f32.xlu0 %v2884_v1  ;;  %v1336_v42 = vmul.f32 %v2892_v22, %v2892_v22  ;;  %v1098_v55 = vmul.f32 %v2884_v1, %v2884_v1  ;;  %v637_v60 = vpop.f32.mrf.mxu0 }
 0x171   : > { %v863_v5 = vpop.xlane.xlu1 %862  ;;  %v1113_v11 = vpop.xlane.xlu0 %1112  ;;  %v1465_v52 = vsub.f32 %v2650_v10, %v2864_v33 }
 0x172   : > { %v1529_v20 = vadd.f32 1e-05, %v1401_v4  ;;  %v1240_v23 = vmul.f32 0.020833334, %v1113_v11  ;;  %v2269_v4 = vpop.f32.mrf.mxu1  ;;  %v2904_v11 = vmul.f32 0.020833334, %v863_v5 }
 0x174   : > { %2308 = vrsqrt.f32 %v1529_v20  ;;  %v1368_v29 = vsub.f32 %v1240_v23, %v1304_v17  ;;  %1150 = vadd.xlane.f32.xlu1 %v1067_v16  ;;  %1148 = vadd.xlane.f32.xlu0 %v1066_v24  ;;  %v2907_v20 = vadd.f32 %v2221_v32, %v2644_v6  ;;  %v797_v5 = vpop.f32.mrf.mxu1  ;;  %v2923_v32 = vld [vmem:[%s3800_s2 + $0x1] ss:$0 sm:$0xff] }
 0x175   : > { %v927_v36 = vpop.xlane.xlu1 %926  ;;  %v1177_v40 = vpop.xlane.xlu0 %1176  ;;  %v2944_v1 = vadd.f32 %v2644_v6, %v797_v5 }
 0x176   : > { %v1496_v45 = vadd.f32 1e-05, %v1368_v29  ;;  %v1272_v53 = vmul.f32 0.020833334, %v1177_v40  ;;  %3826 = vst [vmem:[#allocation9_spill] sm:$0xff] %v2907_v20  ;;  %v2915_v29 = vadd.f32 %v2644_v6, %v637_v60  ;;  %v1433_v40 = vsub.f32 %v2647_v9, %v2858_v19 }
 0x177   : > { %3828 = vst [vmem:[#allocation11_spill] sm:$0xff] %v2944_v1 }
 0x178   : > { %2310 = vrsqrt.f32 %v1496_v45  ;;  %v1400_v56 = vsub.f32 %v1272_v53, %v1336_v42  ;;  %1214 = vadd.xlane.f32.xlu1 %v1099_v54  ;;  %1212 = vadd.xlane.f32.xlu0 %v1098_v55  ;;  %3827 = vst [vmem:[#allocation10_spill] sm:$0xff] %v2915_v29  ;;  %v1307_v45 = vmul.f32 %v2904_v11, %v2904_v11  ;;  %v2934_v54 = vld [vmem:[%s3800_s2 + $0x2] ss:$0 sm:$0xff] }
 0x179   : > { %v861_v16 = vpop.xlane.xlu1 %860  ;;  %v925_v17 = vpop.xlane.xlu0 %924  ;;  %v2928_v53 = vadd.f32 %v2269_v4, %v2644_v6  ;;  %v1068_v10 = vmul.f32 %v2915_v29, %v2915_v29 }
 0x17a   : > { %v1528_v23 = vadd.f32 1e-05, %v1400_v56  ;;  %v2909_v24 = vmul.f32 0.020833334, %v861_v16  ;;  %v2941_v4 = vmul.f32 0.020833334, %v925_v17 }
 0x17c   : > { %2312 = vrsqrt.f32 %v1528_v23  ;;  %898 = vadd.xlane.f32.xlu1 %v2907_v20  ;;  %896 = vadd.xlane.f32.xlu0 %v2915_v29  ;;  %v1306_v56 = vmul.f32 %v2909_v24, %v2909_v24  ;;  %v2939_v23 = vmul.f32 0.020833334, %v927_v36  ;;  %v2953_v36 = vld [vmem:[%s3801_s3 + $0x8] sm:$0xff] }
 0x17d   : > { %v2307_v42 = vpop.eup %2306  ;;  %v1119_v9 = vpop.xlane.xlu1 %1118 }
 0x17e   : > { %v1117_v19 = vpop.xlane.xlu0 %1116  ;;  %v1625_v55 = vmul.f32 %v2307_v42, %v1433_v40  ;;  %v1243_v60 = vmul.f32 0.020833334, %v1119_v9  ;;  %v1069_v9 = vmul.f32 %v2907_v20, %v2907_v20 }
 0x17f   : > { %v1242_v16 = vmul.f32 0.020833334, %v1117_v19 }
 0x180   : > { %v1694_v41 = vmul.f32 %v2923_v32, %v1625_v55  ;;  %v1371_v39 = vsub.f32 %v1243_v60, %v1307_v45  ;;  %962 = vadd.xlane.f32.xlu1 %v2928_v53  ;;  %960 = vadd.xlane.f32.xlu0 %v2944_v1  ;;  %v1338_v60 = vmul.f32 %v2941_v4, %v2941_v4 }
 0x181   : > { %v1370_v40 = vsub.f32 %v1242_v16, %v1306_v56  ;;  %v2309_v42 = vpop.eup %2308  ;;  %v1183_v17 = vpop.xlane.xlu1 %1182  ;;  %v1339_v56 = vmul.f32 %v2939_v23, %v2939_v23 }
 0x182   : > { %v1181_v5 = vpop.xlane.xlu0 %1180  ;;  %v1763_v33 = vadd.f32 %v2934_v54, %v1694_v41  ;;  %v1657_v45 = vmul.f32 %v2309_v42, %v1465_v52  ;;  %v1499_v19 = vadd.f32 1e-05, %v1371_v39  ;;  %v1275_v16 = vmul.f32 0.020833334, %v1183_v17  ;;  %v2224_v52 = vpop.f32.mrf.mxu0 }
 0x183   : > { %v1498_v55 = vadd.f32 1e-05, %v1370_v40  ;;  %v1274_v20 = vmul.f32 0.020833334, %v1181_v5  ;;  %v1432_v39 = vsub.f32 %v2655_v12, %v2881_v57 }
 0x184   : > { %v1835_v29 = vadd.f32 %v2953_v36, %v1763_v33  ;;  %v1726_v41 = vmul.f32 %v2923_v32, %v1657_v45  ;;  %2314 = vrsqrt.f32 %v1499_v19  ;;  %1154 = vadd.xlane.f32.xlu1 %v1069_v9  ;;  %v1403_v42 = vsub.f32 %v1275_v16, %v1339_v56  ;;  %1152 = vadd.xlane.f32.xlu0 %v1068_v10  ;;  %v2272_v19 = vpop.f32.mrf.mxu1  ;;  %v2987_v56 = vld [vmem:[%s3801_s3] sm:$0xff] }
 0x185   : > { %v2311_v40 = vpop.eup %2310  ;;  %2316 = vrsqrt.f32 %v1498_v55  ;;  %v1402_v3 = vsub.f32 %v1274_v20, %v1338_v60  ;;  %v867_v2 = vpop.xlane.xlu1 %866  ;;  %v1101_v33 = vmul.f32 %v2928_v53, %v2928_v53  ;;  %v1100_v9 = vmul.f32 %v2944_v1, %v2944_v1 }
 0x186   : > { %v865_v0 = vpop.xlane.xlu0 %864  ;;  %1899 = vst [vmem:[%s2964_s21 + $0x9] sm:$0xff] %v1835_v29  ;;  %v1795_v17 = vadd.f32 %v2934_v54, %v1726_v41  ;;  %v1624_v5 = vmul.f32 %v2311_v40, %v1432_v39  ;;  %v1531_v12 = vadd.f32 1e-05, %v1403_v42  ;;  %v1464_v20 = vsub.f32 %v2661_v15, %v2892_v22  ;;  %v647_v29 = vpop.f32.mrf.mxu0 }
 0x187   : > { %v1530_v57 = vadd.f32 1e-05, %v1402_v3  ;;  %v2990_v3 = vadd.f32 %v2224_v52, %v2644_v6  ;;  %v2992_v60 = vmul.f32 0.020833334, %v867_v2  ;;  %v2996_v41 = vmul.f32 0.020833334, %v865_v0  ;;  %v807_v2 = vpop.f32.mrf.mxu1 }
 0x188   : > { %v1867_v45 = vadd.f32 %v2953_v36, %v1795_v17  ;;  %v1693_v10 = vmul.f32 %v2923_v32, %v1624_v5  ;;  %1218 = vadd.xlane.f32.xlu1 %v1101_v33  ;;  %2318 = vrsqrt.f32 %v1531_v12  ;;  %1216 = vadd.xlane.f32.xlu0 %v1100_v9  ;;  %v2999_v40 = vadd.f32 %v2644_v6, %v647_v29 }
 0x189   : > { %v2313_v55 = vpop.eup %2312  ;;  %3829 = vst [vmem:[#allocation12_spill] sm:$0xff] %v2990_v3  ;;  %v931_v16 = vpop.xlane.xlu1 %930  ;;  %2320 = vrsqrt.f32 %v1530_v57  ;;  %v1309_v17 = vmul.f32 %v2992_v60, %v2992_v60  ;;  %v3007_v5 = vadd.f32 %v2272_v19, %v2644_v6  ;;  %v1308_v9 = vmul.f32 %v2996_v41, %v2996_v41 }
 0x18a   : > { %v929_v15 = vpop.xlane.xlu0 %928  ;;  %1931 = vst [vmem:[%s2964_s21 + $0x129] sm:$0xff] %v1867_v45  ;;  %v1762_v22 = vadd.f32 %v2934_v54, %v1693_v10  ;;  %v1656_v39 = vmul.f32 %v2313_v55, %v1464_v20  ;;  %v3009_v33 = vmul.f32 0.020833334, %v931_v16  ;;  %v3019_v29 = vadd.f32 %v2644_v6, %v807_v2 }
 0x18b   : > { %v3016_v10 = vmul.f32 0.020833334, %v929_v15  ;;  %v1435_v19 = vsub.f32 %v2666_v18, %v2904_v11  ;;  %v1071_v18 = vmul.f32 %v2990_v3, %v2990_v3 }
 0x18c   : > { %v1834_v42 = vadd.f32 %v2987_v56, %v1762_v22  ;;  %v1725_v52 = vmul.f32 %v2923_v32, %v1656_v39  ;;  %902 = vadd.xlane.f32.xlu1 %v2990_v3  ;;  %900 = vadd.xlane.f32.xlu0 %v2999_v40  ;;  %v1341_v15 = vmul.f32 %v3009_v33, %v3009_v33  ;;  %v2227_v3 = vpop.f32.mrf.mxu0 }
 0x18d   : > { %v1123_v0 = vpop.xlane.xlu1 %1122 }
 0x18e   : > { %v1121_v12 = vpop.xlane.xlu0 %1120  ;;  %1898 = vst [vmem:[%s2964_s21 + $0x1] sm:$0xff] %v1834_v42  ;;  %v1794_v57 = vadd.f32 %v2934_v54, %v1725_v52  ;;  %v1245_v45 = vmul.f32 0.020833334, %v1123_v0  ;;  %v1434_v42 = vsub.f32 %v2679_v25, %v2909_v24  ;;  %v1340_v25 = vmul.f32 %v3016_v10, %v3016_v10 }
 0x18f   : > { %v1244_v20 = vmul.f32 0.020833334, %v1121_v12 }
 0x190   : > { %v1866_v55 = vadd.f32 %v2987_v56, %v1794_v57  ;;  %v1373_v16 = vsub.f32 %v1245_v45, %v1309_v17  ;;  %966 = vadd.xlane.f32.xlu1 %v3007_v5  ;;  %964 = vadd.xlane.f32.xlu0 %v3019_v29  ;;  %v1070_v45 = vmul.f32 %v2999_v40, %v2999_v40 }
 0x191   : > { %v1372_v22 = vsub.f32 %v1244_v20, %v1308_v9  ;;  %v2315_v39 = vpop.eup %2314  ;;  %v1187_v52 = vpop.xlane.xlu1 %1186 }
 0x192   : > { %v1185_v2 = vpop.xlane.xlu0 %1184  ;;  %v2317_v11 = vpop.eup %2316  ;;  %1930 = vst [vmem:[%s2964_s21 + $0x121] sm:$0xff] %v1866_v55  ;;  %v1627_v17 = vmul.f32 %v2315_v39, %v1435_v19  ;;  %v1501_v0 = vadd.f32 1e-05, %v1373_v16  ;;  %v1277_v57 = vmul.f32 0.020833334, %v1187_v52  ;;  %v1467_v19 = vsub.f32 %v2672_v21, %v2939_v23  ;;  %v3043_v55 = vld [vmem:[%s3801_s3 + $0x18] sm:$0xff] }
 0x193   : > { %v1500_v12 = vadd.f32 1e-05, %v1372_v22  ;;  %v1626_v9 = vmul.f32 %v2317_v11, %v1434_v42  ;;  %v1276_v24 = vmul.f32 0.020833334, %v1185_v2  ;;  %v3052_v21 = vld [vmem:[%s3801_s3 + $0x10] sm:$0xff] }
 0x194   : > { %v1696_v20 = vmul.f32 %v2923_v32, %v1627_v17  ;;  %2322 = vrsqrt.f32 %v1501_v0  ;;  %v1405_v1 = vsub.f32 %v1277_v57, %v1341_v15  ;;  %1158 = vadd.xlane.f32.xlu1 %v1071_v18  ;;  %1156 = vadd.xlane.f32.xlu0 %v1070_v45  ;;  %v1466_v15 = vsub.f32 %v2682_v26, %v2941_v4 }
 0x195   : > { %v1695_v16 = vmul.f32 %v2923_v32, %v1626_v9  ;;  %2324 = vrsqrt.f32 %v1500_v12  ;;  %v1404_v22 = vsub.f32 %v1276_v24, %v1340_v25  ;;  %v871_v39 = vpop.xlane.xlu1 %870  ;;  %v2319_v52 = vpop.eup %2318  ;;  %v1103_v18 = vmul.f32 %v3007_v5, %v3007_v5 }
 0x196   : > { %v869_v42 = vpop.xlane.xlu0 %868  ;;  %v1765_v2 = vadd.f32 %v2934_v54, %v1696_v20  ;;  %v1533_v23 = vadd.f32 1e-05, %v1405_v1  ;;  %v2321_v11 = vpop.eup %2320  ;;  %v1659_v0 = vmul.f32 %v2319_v52, %v1467_v19  ;;  %v1102_v26 = vmul.f32 %v3019_v29, %v3019_v29 }
 0x197   : > { %v1764_v17 = vadd.f32 %v2934_v54, %v1695_v16  ;;  %v1532_v12 = vadd.f32 1e-05, %v1404_v22  ;;  %v1658_v57 = vmul.f32 %v2321_v11, %v1466_v15  ;;  %v657_v9 = vpop.f32.mrf.mxu0  ;;  %v2275_v1 = vpop.f32.mrf.mxu1  ;;  %v3062_v45 = vmul.f32 0.020833334, %v871_v39 }
 0x198   : > { %v1837_v4 = vadd.f32 %v3043_v55, %v1765_v2  ;;  %2326 = vrsqrt.f32 %v1533_v23  ;;  %1222 = vadd.xlane.f32.xlu1 %v1103_v18  ;;  %v1728_v24 = vmul.f32 %v2923_v32, %v1659_v0  ;;  %1220 = vadd.xlane.f32.xlu0 %v1102_v26  ;;  %v3067_v22 = vadd.f32 %v2227_v3, %v2644_v6 }
 0x199   : > { %v1836_v25 = vadd.f32 %v3052_v21, %v1764_v17  ;;  %2328 = vrsqrt.f32 %v1532_v12  ;;  %v935_v20 = vpop.xlane.xlu1 %934  ;;  %v1727_v16 = vmul.f32 %v2923_v32, %v1658_v57  ;;  %v3069_v52 = vmul.f32 0.020833334, %v869_v42  ;;  %v817_v23 = vpop.f32.mrf.mxu1 }
 0x19a   : > { %v933_v19 = vpop.xlane.xlu0 %932  ;;  %1901 = vst [vmem:[%s2964_s21 + $0x19] sm:$0xff] %v1837_v4  ;;  %3830 = vst [vmem:[#allocation13_spill] sm:$0xff] %v3067_v22  ;;  %v1797_v15 = vadd.f32 %v2934_v54, %v1728_v24  ;;  %v3074_v2 = vadd.f32 %v2644_v6, %v657_v9  ;;  %v1311_v3 = vmul.f32 %v3062_v45, %v3062_v45  ;;  %v3084_v11 = vmul.f32 0.020833334, %v935_v20 }
 0x19b   : > { %1900 = vst [vmem:[%s2964_s21 + $0x11] sm:$0xff] %v1836_v25  ;;  %v1796_v39 = vadd.f32 %v2934_v54, %v1727_v16  ;;  %v3082_v42 = vadd.f32 %v2275_v1, %v2644_v6  ;;  %v1310_v26 = vmul.f32 %v3069_v52, %v3069_v52  ;;  %v3091_v9 = vmul.f32 0.020833334, %v933_v19 }
 0x19c   : > { %906 = vadd.xlane.f32.xlu1 %v3067_v22  ;;  %v1869_v18 = vadd.f32 %v3043_v55, %v1797_v15  ;;  %904 = vadd.xlane.f32.xlu0 %v3074_v2  ;;  %v3094_v25 = vadd.f32 %v2644_v6, %v817_v23  ;;  %v1437_v1 = vsub.f32 %v2695_v34, %v2992_v60 }
 0x19d   : > { %v1127_v17 = vpop.xlane.xlu1 %1126  ;;  %v1868_v12 = vadd.f32 %v3052_v21, %v1796_v39  ;;  %v1436_v15 = vsub.f32 %v2698_v35, %v2996_v41  ;;  %v1343_v39 = vmul.f32 %v3084_v11, %v3084_v11  ;;  %v1072_v41 = vmul.f32 %v3074_v2, %v3074_v2 }
 0x19e   : > { %v1125_v0 = vpop.xlane.xlu0 %1124  ;;  %v1247_v4 = vmul.f32 0.020833334, %v1127_v17  ;;  %1933 = vst [vmem:[%s2964_s21 + $0x139] sm:$0xff] %v1869_v18  ;;  %v1073_v18 = vmul.f32 %v3067_v22, %v3067_v22 }
 0x19f   : > { %v1246_v57 = vmul.f32 0.020833334, %v1125_v0  ;;  %1932 = vst [vmem:[%s2964_s21 + $0x131] sm:$0xff] %v1868_v12 }
 0x1a0   : > { %v1375_v24 = vsub.f32 %v1247_v4, %v1311_v3  ;;  %970 = vadd.xlane.f32.xlu1 %v3082_v42  ;;  %968 = vadd.xlane.f32.xlu0 %v3094_v25  ;;  %v1469_v4 = vsub.f32 %v2703_v37, %v3009_v33 }
 0x1a1   : > { %v1374_v20 = vsub.f32 %v1246_v57, %v1310_v26  ;;  %v2323_v16 = vpop.eup %2322  ;;  %v1191_v19 = vpop.xlane.xlu1 %1190  ;;  %v1342_v26 = vmul.f32 %v3091_v9, %v3091_v9 }
 0x1a2   : > { %v1189_v23 = vpop.xlane.xlu0 %1188  ;;  %v2325_v17 = vpop.eup %2324  ;;  %v1629_v34 = vmul.f32 %v2323_v16, %v1437_v1  ;;  %v1503_v60 = vadd.f32 1e-05, %v1375_v24  ;;  %v1279_v0 = vmul.f32 0.020833334, %v1191_v19  ;;  %v3119_v16 = vld [vmem:[%s3801_s3 + $0x28] sm:$0xff] }
 0x1a3   : > { %v1502_v3 = vadd.f32 1e-05, %v1374_v20  ;;  %v1628_v12 = vmul.f32 %v2325_v17, %v1436_v15  ;;  %v1278_v35 = vmul.f32 0.020833334, %v1189_v23  ;;  %v2230_v1 = vpop.f32.mrf.mxu0  ;;  %v1468_v20 = vsub.f32 %v2706_v38, %v3016_v10 }
 0x1a4   : > { %v1698_v57 = vmul.f32 %v2923_v32, %v1629_v34  ;;  %2330 = vrsqrt.f32 %v1503_v60  ;;  %v1407_v22 = vsub.f32 %v1279_v0, %v1343_v39  ;;  %1162 = vadd.xlane.f32.xlu1 %v1073_v18  ;;  %1160 = vadd.xlane.f32.xlu0 %v1072_v41  ;;  %v3126_v18 = vld [vmem:[%s3801_s3 + $0x20] sm:$0xff]  ;;  %v1105_v17 = vmul.f32 %v3082_v42, %v3082_v42 }
 0x1a5   : > { %v2327_v24 = vpop.eup %2326  ;;  %v1697_v15 = vmul.f32 %v2923_v32, %v1628_v12  ;;  %2332 = vrsqrt.f32 %v1502_v3  ;;  %v1406_v19 = vsub.f32 %v1278_v35, %v1342_v26  ;;  %v875_v37 = vpop.xlane.xlu1 %874  ;;  %v1104_v0 = vmul.f32 %v3094_v25, %v3094_v25 }
 0x1a6   : > { %v873_v33 = vpop.xlane.xlu0 %872  ;;  %v2329_v23 = vpop.eup %2328  ;;  %v1767_v39 = vadd.f32 %v2934_v54, %v1698_v57  ;;  %v1661_v38 = vmul.f32 %v2327_v24, %v1469_v4  ;;  %v1535_v10 = vadd.f32 1e-05, %v1407_v22 }
 0x1a7   : > { %v1766_v34 = vadd.f32 %v2934_v54, %v1697_v15  ;;  %v1660_v60 = vmul.f32 %v2329_v23, %v1468_v20  ;;  %v1534_v3 = vadd.f32 1e-05, %v1406_v19  ;;  %v667_v35 = vpop.f32.mrf.mxu0  ;;  %v2278_v22 = vpop.f32.mrf.mxu1  ;;  %v3140_v15 = vadd.f32 %v2230_v1, %v2644_v6 }
 0x1a8   : > { %v1839_v12 = vadd.f32 %v3119_v16, %v1767_v39  ;;  %v1730_v26 = vmul.f32 %v2923_v32, %v1661_v38  ;;  %2334 = vrsqrt.f32 %v1535_v10  ;;  %1226 = vadd.xlane.f32.xlu1 %v1105_v17  ;;  %1224 = vadd.xlane.f32.xlu0 %v1104_v0  ;;  %v3142_v19 = vmul.f32 0.020833334, %v875_v37 }
 0x1a9   : > { %v1838_v41 = vadd.f32 %v3126_v18, %v1766_v34  ;;  %v1729_v4 = vmul.f32 %v2923_v32, %v1660_v60  ;;  %2336 = vrsqrt.f32 %v1534_v3  ;;  %v939_v57 = vpop.xlane.xlu1 %938  ;;  %3831 = vst [vmem:[#allocation14_spill] sm:$0xff] %v3140_v15  ;;  %v3144_v23 = vmul.f32 0.020833334, %v873_v33  ;;  %v827_v17 = vpop.f32.mrf.mxu1 }
 0x1aa   : > { %v937_v24 = vpop.xlane.xlu0 %936  ;;  %1903 = vst [vmem:[%s2964_s21 + $0x29] sm:$0xff] %v1839_v12  ;;  %v1799_v20 = vadd.f32 %v2934_v54, %v1730_v26  ;;  %v3149_v38 = vadd.f32 %v2644_v6, %v667_v35  ;;  %v3155_v1 = vadd.f32 %v2278_v22, %v2644_v6  ;;  %v3157_v37 = vmul.f32 0.020833334, %v939_v57 }
 0x1ab   : > { %1902 = vst [vmem:[%s2964_s21 + $0x21] sm:$0xff] %v1838_v41  ;;  %v1798_v39 = vadd.f32 %v2934_v54, %v1729_v4  ;;  %v1313_v3 = vmul.f32 %v3142_v19, %v3142_v19  ;;  %v1312_v0 = vmul.f32 %v3144_v23, %v3144_v23  ;;  %v3166_v35 = vmul.f32 0.020833334, %v937_v24 }
 0x1ac   : > { %v1871_v10 = vadd.f32 %v3119_v16, %v1799_v20  ;;  %910 = vadd.xlane.f32.xlu1 %v3140_v15  ;;  %3832 = vst [vmem:[#allocation15_spill] sm:$0xff] %v3155_v1  ;;  %908 = vadd.xlane.f32.xlu0 %v3149_v38  ;;  %v3169_v22 = vadd.f32 %v2644_v6, %v827_v17 }
 0x1ad   : > { %v1870_v34 = vadd.f32 %v3126_v18, %v1798_v39  ;;  %v1131_v33 = vpop.xlane.xlu1 %1130  ;;  %v1439_v41 = vsub.f32 %v2719_v46, %v3062_v45  ;;  %v1438_v39 = vsub.f32 %v2722_v47, %v3069_v52  ;;  %v1075_v6 = vmul.f32 %v3140_v15, %v3140_v15 }
 0x1ae   : > { %v1129_v60 = vpop.xlane.xlu0 %1128  ;;  %1935 = vst [vmem:[%s2964_s21 + $0x149] sm:$0xff] %v1871_v10  ;;  %v1249_v12 = vmul.f32 0.020833334, %v1131_v33  ;;  %3833 = vst [vmem:[#allocation16_spill] sm:$0xff] %v3169_v22  ;;  %v1345_v10 = vmul.f32 %v3157_v37, %v3157_v37  ;;  %v1074_v52 = vmul.f32 %v3149_v38, %v3149_v38 }
 0x1af   : > { %v1248_v26 = vmul.f32 0.020833334, %v1129_v60  ;;  %1934 = vst [vmem:[%s2964_s21 + $0x141] sm:$0xff] %v1870_v34 }
 0x1b0   : > { %v1377_v4 = vsub.f32 %v1249_v12, %v1313_v3  ;;  %974 = vadd.xlane.f32.xlu1 %v3155_v1  ;;  %972 = vadd.xlane.f32.xlu0 %v3169_v22  ;;  %v1471_v12 = vsub.f32 %v2727_v49, %v3084_v11 }
 0x1b1   : > { %v1376_v57 = vsub.f32 %v1248_v26, %v1312_v0  ;;  %v2331_v20 = vpop.eup %2330  ;;  %v1195_v24 = vpop.xlane.xlu1 %1194  ;;  %v1344_v0 = vmul.f32 %v3166_v35, %v3166_v35 }
 0x1b2   : > { %v1193_v34 = vpop.xlane.xlu0 %1192  ;;  %v2333_v17 = vpop.eup %2332  ;;  %v1631_v46 = vmul.f32 %v2331_v20, %v1439_v41  ;;  %v1505_v45 = vadd.f32 1e-05, %v1377_v4  ;;  %v1281_v60 = vmul.f32 0.020833334, %v1195_v24  ;;  %v3193_v20 = vld [vmem:[%s3801_s3 + $0x38] sm:$0xff] }
 0x1b3   : > { %v1504_v33 = vadd.f32 1e-05, %v1376_v57  ;;  %v1630_v3 = vmul.f32 %v2333_v17, %v1438_v39  ;;  %v1280_v47 = vmul.f32 0.020833334, %v1193_v34  ;;  %v2233_v41 = vpop.f32.mrf.mxu0  ;;  %v1470_v57 = vsub.f32 %v2730_v50, %v3091_v9 }
 0x1b4   : > { %v1700_v26 = vmul.f32 %v2923_v32, %v1631_v46  ;;  %2338 = vrsqrt.f32 %v1505_v45  ;;  %v1409_v15 = vsub.f32 %v1281_v60, %v1345_v10  ;;  %1166 = vadd.xlane.f32.xlu1 %v1075_v6  ;;  %1164 = vadd.xlane.f32.xlu0 %v1074_v52  ;;  %v3200_v6 = vld [vmem:[%s3801_s3 + $0x30] sm:$0xff]  ;;  %v1107_v17 = vmul.f32 %v3155_v1, %v3155_v1 }
 0x1b5   : > { %v2335_v4 = vpop.eup %2334  ;;  %v1699_v39 = vmul.f32 %v2923_v32, %v1630_v3  ;;  %2340 = vrsqrt.f32 %v1504_v33  ;;  %v1408_v24 = vsub.f32 %v1280_v47, %v1344_v0  ;;  %v879_v49 = vpop.xlane.xlu1 %878  ;;  %v1106_v60 = vmul.f32 %v3169_v22, %v3169_v22 }
 0x1b6   : > { %v877_v11 = vpop.xlane.xlu0 %876  ;;  %v2337_v34 = vpop.eup %2336  ;;  %v1769_v10 = vadd.f32 %v2934_v54, %v1700_v26  ;;  %v1663_v50 = vmul.f32 %v2335_v4, %v1471_v12  ;;  %v1537_v9 = vadd.f32 1e-05, %v1409_v15  ;;  %v1473_v22 = vsub.f32 %v2751_v61, %v3157_v37 }
 0x1b7   : > { %v1768_v46 = vadd.f32 %v2934_v54, %v1699_v39  ;;  %v1662_v45 = vmul.f32 %v2337_v34, %v1470_v57  ;;  %v1536_v33 = vadd.f32 1e-05, %v1408_v24  ;;  %v677_v47 = vpop.f32.mrf.mxu0  ;;  %v2281_v15 = vpop.f32.mrf.mxu1  ;;  %v3216_v39 = vld [vmem:[%s3800_s2] ss:$0 sm:$0xff]  ;;  %v3221_v34 = vmul.f32 0.020833334, %v879_v49 }
 0x1b8   : > { %v1841_v3 = vadd.f32 %v3193_v20, %v1769_v10  ;;  %v1732_v0 = vmul.f32 %v2923_v32, %v1663_v50  ;;  %2342 = vrsqrt.f32 %v1537_v9  ;;  %1230 = vadd.xlane.f32.xlu1 %v1107_v17  ;;  %1228 = vadd.xlane.f32.xlu0 %v1106_v60  ;;  %v3219_v24 = vadd.f32 %v3216_v39, %v2233_v41 }
 0x1b9   : > { %v1840_v52 = vadd.f32 %v3200_v6, %v1768_v46  ;;  %v1731_v12 = vmul.f32 %v2923_v32, %v1662_v45  ;;  %2344 = vrsqrt.f32 %v1536_v33  ;;  %v943_v26 = vpop.xlane.xlu1 %942  ;;  %v3223_v10 = vmul.f32 0.020833334, %v877_v11  ;;  %v837_v46 = vpop.f32.mrf.mxu1 }
 0x1ba   : > { %v941_v4 = vpop.xlane.xlu0 %940  ;;  %1905 = vst [vmem:[%s2964_s21 + $0x39] sm:$0xff] %v1841_v3  ;;  %v1801_v57 = vadd.f32 %v2934_v54, %v1732_v0  ;;  %3834 = vst [vmem:[#allocation17_spill] sm:$0xff] %v3219_v24  ;;  %v3228_v9 = vadd.f32 %v3216_v39, %v677_v47  ;;  %v3234_v41 = vadd.f32 %v3216_v39, %v2281_v15  ;;  %v3236_v49 = vmul.f32 0.020833334, %v943_v26 }
 0x1bb   : > { %1904 = vst [vmem:[%s2964_s21 + $0x31] sm:$0xff] %v1840_v52  ;;  %v1800_v50 = vadd.f32 %v2934_v54, %v1731_v12  ;;  %v1315_v60 = vmul.f32 %v3221_v34, %v3221_v34  ;;  %v1314_v3 = vmul.f32 %v3223_v10, %v3223_v10  ;;  %v3245_v52 = vmul.f32 0.020833334, %v941_v4 }
 0x1bc   : > { %v1873_v17 = vadd.f32 %v3193_v20, %v1801_v57  ;;  %914 = vadd.xlane.f32.xlu1 %v3219_v24  ;;  %912 = vadd.xlane.f32.xlu0 %v3228_v9  ;;  %v3248_v15 = vadd.f32 %v3216_v39, %v837_v46  ;;  %v1441_v12 = vsub.f32 %v2743_v58, %v3142_v19 }
 0x1bd   : > { %v1872_v45 = vadd.f32 %v3200_v6, %v1800_v50  ;;  %v1135_v11 = vpop.xlane.xlu1 %1134  ;;  %v1077_v46 = vmul.f32 %v3219_v24, %v3219_v24 }
 0x1be   : > { %v1133_v33 = vpop.xlane.xlu0 %1132  ;;  %1937 = vst [vmem:[%s2964_s21 + $0x159] sm:$0xff] %v1873_v17  ;;  %v1251_v0 = vmul.f32 0.020833334, %v1135_v11  ;;  %v1440_v17 = vsub.f32 %v2746_v59, %v3144_v23  ;;  %v1347_v11 = vmul.f32 %v3236_v49, %v3236_v49  ;;  %v1076_v23 = vmul.f32 %v3228_v9, %v3228_v9 }
 0x1bf   : > { %v1250_v47 = vmul.f32 0.020833334, %v1133_v33  ;;  %1936 = vst [vmem:[%s2964_s21 + $0x151] sm:$0xff] %v1872_v45 }
 0x1c0   : > { %v1379_v26 = vsub.f32 %v1251_v0, %v1315_v60  ;;  %978 = vadd.xlane.f32.xlu1 %v3234_v41  ;;  %976 = vadd.xlane.f32.xlu0 %v3248_v15 }
 0x1c1   : > { %v1378_v57 = vsub.f32 %v1250_v47, %v1314_v3  ;;  %v2339_v50 = vpop.eup %2338  ;;  %v1199_v4 = vpop.xlane.xlu1 %1198  ;;  %v1346_v47 = vmul.f32 %v3245_v52, %v3245_v52 }
 0x1c2   : > { %v1197_v45 = vpop.xlane.xlu0 %1196  ;;  %v2341_v33 = vpop.eup %2340  ;;  %v1633_v58 = vmul.f32 %v2339_v50, %v1441_v12  ;;  %v1507_v19 = vadd.f32 1e-05, %v1379_v26  ;;  %v1283_v3 = vmul.f32 0.020833334, %v1199_v4 }
 0x1c3   : > { %v1506_v60 = vadd.f32 1e-05, %v1378_v57  ;;  %v1632_v0 = vmul.f32 %v2341_v33, %v1440_v17  ;;  %v1282_v59 = vmul.f32 0.020833334, %v1197_v45  ;;  %v2236_v12 = vpop.f32.mrf.mxu0  ;;  %v1472_v57 = vsub.f32 %v2754_v62, %v3166_v35 }
 0x1c4   : > { %v1702_v1 = vmul.f32 %v2923_v32, %v1633_v58  ;;  %2346 = vrsqrt.f32 %v1507_v19  ;;  %v1411_v24 = vsub.f32 %v1283_v3, %v1347_v11  ;;  %1170 = vadd.xlane.f32.xlu1 %v1077_v46  ;;  %1168 = vadd.xlane.f32.xlu0 %v1076_v23  ;;  %v1109_v11 = vmul.f32 %v3234_v41, %v3234_v41 }
 0x1c5   : > { %v2343_v26 = vpop.eup %2342  ;;  %v1701_v50 = vmul.f32 %v2923_v32, %v1632_v0  ;;  %2348 = vrsqrt.f32 %v1506_v60  ;;  %v1410_v17 = vsub.f32 %v1282_v59, %v1346_v47  ;;  %v883_v4 = vpop.xlane.xlu1 %882  ;;  %v1108_v35 = vmul.f32 %v3248_v15, %v3248_v15 }
 0x1c6   : > { %v881_v45 = vpop.xlane.xlu0 %880  ;;  %v2345_v33 = vpop.eup %2344  ;;  %v1771_v61 = vadd.f32 %v2934_v54, %v1702_v1  ;;  %v1665_v37 = vmul.f32 %v2343_v26, %v1473_v22  ;;  %v1539_v58 = vadd.f32 1e-05, %v1411_v24  ;;  %v3283_v26 = vadd.f32 %v3216_v39, %v2236_v12 }
 0x1c7   : > { %v1770_v46 = vadd.f32 %v2934_v54, %v1701_v50  ;;  %v1664_v19 = vmul.f32 %v2345_v33, %v1472_v57  ;;  %v1538_v62 = vadd.f32 1e-05, %v1410_v17  ;;  %v687_v1 = vpop.f32.mrf.mxu0  ;;  %v2284_v22 = vpop.f32.mrf.mxu1  ;;  %v3285_v57 = vmul.f32 0.020833334, %v883_v4 }
 0x1c8   : > { %v1843_v60 = vadd.f32 %v2953_v36, %v1771_v61  ;;  %v1734_v3 = vmul.f32 %v2923_v32, %v1665_v37  ;;  %2350 = vrsqrt.f32 %v1539_v58  ;;  %1234 = vadd.xlane.f32.xlu1 %v1109_v11  ;;  %1232 = vadd.xlane.f32.xlu0 %v1108_v35  ;;  %v3287_v50 = vmul.f32 0.020833334, %v881_v45 }
 0x1c9   : > { %v1842_v24 = vadd.f32 %v2987_v56, %v1770_v46  ;;  %v1733_v0 = vmul.f32 %v2923_v32, %v1664_v19  ;;  %2352 = vrsqrt.f32 %v1538_v62  ;;  %v947_v47 = vpop.xlane.xlu1 %946  ;;  %v3292_v33 = vadd.f32 %v3216_v39, %v687_v1  ;;  %v847_v37 = vpop.f32.mrf.mxu1 }
 0x1ca   : > { %v945_v59 = vpop.xlane.xlu0 %944  ;;  %1907 = vst [vmem:[%s2964_s21 + $0x51] sm:$0xff] %v1843_v60  ;;  %v1803_v23 = vadd.f32 %v2934_v54, %v1734_v3  ;;  %v3298_v12 = vadd.f32 %v3216_v39, %v2284_v22  ;;  %v3300_v4 = vmul.f32 0.020833334, %v947_v47  ;;  %v1317_v46 = vmul.f32 %v3285_v57, %v3285_v57 }
 0x1cb   : > { %1906 = vst [vmem:[%s2964_s21 + $0x49] sm:$0xff] %v1842_v24  ;;  %v1802_v17 = vadd.f32 %v2934_v54, %v1733_v0  ;;  %v3312_v35 = vadd.f32 %v3216_v39, %v847_v37  ;;  %v1443_v60 = vsub.f32 %v2767_v7, %v3221_v34  ;;  %v1442_v24 = vsub.f32 %v2770_v8, %v3223_v10 }
 0x1cc   : > { %v1875_v61 = vadd.f32 %v2953_v36, %v1803_v23  ;;  %918 = vadd.xlane.f32.xlu1 %v3283_v26  ;;  %916 = vadd.xlane.f32.xlu0 %v3292_v33  ;;  %v1316_v36 = vmul.f32 %v3287_v50, %v3287_v50  ;;  %v1349_v0 = vmul.f32 %v3300_v4, %v3300_v4 }
 0x1cd   : > { %v1874_v58 = vadd.f32 %v2987_v56, %v1802_v17  ;;  %v1139_v45 = vpop.xlane.xlu1 %1138  ;;  %v3309_v56 = vmul.f32 0.020833334, %v945_v59  ;;  %v1079_v39 = vmul.f32 %v3283_v26, %v3283_v26  ;;  %v1078_v10 = vmul.f32 %v3292_v33, %v3292_v33 }
 0x1ce   : > { %v1137_v11 = vpop.xlane.xlu0 %1136  ;;  %1939 = vst [vmem:[%s2964_s21 + $0x171] sm:$0xff] %v1875_v61  ;;  %v1253_v19 = vmul.f32 0.020833334, %v1139_v45  ;;  %v1475_v45 = vsub.f32 %v2775_v13, %v3236_v49 }
 0x1cf   : > { %v1252_v62 = vmul.f32 0.020833334, %v1137_v11  ;;  %1938 = vst [vmem:[%s2964_s21 + $0x169] sm:$0xff] %v1874_v58  ;;  %v1348_v58 = vmul.f32 %v3309_v56, %v3309_v56 }
 0x1d0   : > { %v1381_v3 = vsub.f32 %v1253_v19, %v1317_v46  ;;  %982 = vadd.xlane.f32.xlu1 %v3298_v12  ;;  %980 = vadd.xlane.f32.xlu0 %v3312_v35  ;;  %v1474_v19 = vsub.f32 %v2778_v14, %v3245_v52  ;;  %v1110_v52 = vmul.f32 %v3312_v35, %v3312_v35 }
 0x1d1   : > { %v1380_v1 = vsub.f32 %v1252_v62, %v1316_v36  ;;  %v2347_v22 = vpop.eup %2346  ;;  %v1203_v47 = vpop.xlane.xlu1 %1202 }
 0x1d2   : > { %v1201_v59 = vpop.xlane.xlu0 %1200  ;;  %v2349_v23 = vpop.eup %2348  ;;  %v1635_v7 = vmul.f32 %v2347_v22, %v1443_v60  ;;  %v1509_v34 = vadd.f32 1e-05, %v1381_v3  ;;  %v1285_v61 = vmul.f32 0.020833334, %v1203_v47 }
 0x1d3   : > { %v1508_v17 = vadd.f32 1e-05, %v1380_v1  ;;  %v1634_v37 = vmul.f32 %v2349_v23, %v1442_v24  ;;  %v1284_v8 = vmul.f32 0.020833334, %v1201_v59 }
 0x1d4   : > { %v1704_v11 = vmul.f32 %v2923_v32, %v1635_v7  ;;  %2354 = vrsqrt.f32 %v1509_v34  ;;  %v1413_v46 = vsub.f32 %v1285_v61, %v1349_v0  ;;  %1174 = vadd.xlane.f32.xlu1 %v1079_v39  ;;  %1172 = vadd.xlane.f32.xlu0 %v1078_v10  ;;  %v1111_v0 = vmul.f32 %v3298_v12, %v3298_v12 }
 0x1d5   : > { %v2351_v36 = vpop.eup %2350  ;;  %v1703_v62 = vmul.f32 %v2923_v32, %v1634_v37  ;;  %2356 = vrsqrt.f32 %v1508_v17  ;;  %v1412_v60 = vsub.f32 %v1284_v8, %v1348_v58  ;;  %v887_v3 = vpop.xlane.xlu1 %886 }
 0x1d6   : > { %v885_v1 = vpop.xlane.xlu0 %884  ;;  %v2353_v22 = vpop.eup %2352  ;;  %v1773_v24 = vadd.f32 %v2934_v54, %v1704_v11  ;;  %v1667_v13 = vmul.f32 %v2351_v36, %v1475_v45  ;;  %v1541_v49 = vadd.f32 1e-05, %v1413_v46  ;;  %v3346_v58 = vmul.f32 0.020833334, %v887_v3 }
 0x1d7   : > { %v1772_v47 = vadd.f32 %v2934_v54, %v1703_v62  ;;  %v1666_v59 = vmul.f32 %v2353_v22, %v1474_v19  ;;  %v1540_v14 = vadd.f32 1e-05, %v1412_v60  ;;  %v3348_v8 = vmul.f32 0.020833334, %v885_v1 }
 0x1d8   : > { %v1845_v39 = vadd.f32 %v3043_v55, %v1773_v24  ;;  %v1736_v23 = vmul.f32 %v2923_v32, %v1667_v13  ;;  %2358 = vrsqrt.f32 %v1541_v49  ;;  %1238 = vadd.xlane.f32.xlu1 %v1111_v0  ;;  %1236 = vadd.xlane.f32.xlu0 %v1110_v52  ;;  %v1319_v62 = vmul.f32 %v3346_v58, %v3346_v58 }
 0x1d9   : > { %v1844_v7 = vadd.f32 %v3052_v21, %v1772_v47  ;;  %v1735_v34 = vmul.f32 %v2923_v32, %v1666_v59  ;;  %2360 = vrsqrt.f32 %v1540_v14  ;;  %v951_v17 = vpop.xlane.xlu1 %950  ;;  %v1318_v60 = vmul.f32 %v3348_v8, %v3348_v8 }
 0x1da   : > { %v949_v61 = vpop.xlane.xlu0 %948  ;;  %1909 = vst [vmem:[%s2964_s21 + $0x61] sm:$0xff] %v1845_v39  ;;  %v1805_v37 = vadd.f32 %v2934_v54, %v1736_v23  ;;  %v3354_v46 = vmul.f32 0.020833334, %v951_v17  ;;  %v1444_v13 = vsub.f32 %v2794_v28, %v3287_v50 }
 0x1db   : > { %1908 = vst [vmem:[%s2964_s21 + $0x59] sm:$0xff] %v1844_v7  ;;  %v1804_v10 = vadd.f32 %v2934_v54, %v1735_v34  ;;  %v3362_v22 = vmul.f32 0.020833334, %v949_v61  ;;  %v1445_v54 = vsub.f32 %v2791_v27, %v3285_v57  ;;  %v1477_v34 = vsub.f32 %v2799_v30, %v3300_v4 }
 0x1dc   : > { %v1877_v45 = vadd.f32 %v3043_v55, %v1805_v37  ;;  %v1351_v49 = vmul.f32 %v3354_v46, %v3354_v46  ;;  %v1476_v61 = vsub.f32 %v2802_v31, %v3309_v56  ;;  %v3380_v37 = vld [vmem:[%s3800_s2 + $0x1] ss:$0 sm:$0xff] }
 0x1dd   : > { %v1876_v11 = vadd.f32 %v3052_v21, %v1804_v10  ;;  %v1143_v36 = vpop.xlane.xlu1 %1142  ;;  %v1350_v27 = vmul.f32 %v3362_v22, %v3362_v22 }
 0x1de   : > { %v1141_v19 = vpop.xlane.xlu0 %1140  ;;  %1941 = vst [vmem:[%s2964_s21 + $0x181] sm:$0xff] %v1877_v45  ;;  %v1255_v3 = vmul.f32 0.020833334, %v1143_v36 }
 0x1df   : > { %v1254_v1 = vmul.f32 0.020833334, %v1141_v19  ;;  %1940 = vst [vmem:[%s2964_s21 + $0x179] sm:$0xff] %v1876_v11 }
 0x1e0   : > { %v1383_v55 = vsub.f32 %v1255_v3, %v1319_v62 }
 0x1e1   : > { %v1382_v21 = vsub.f32 %v1254_v1, %v1318_v60  ;;  %v2355_v24 = vpop.eup %2354  ;;  %v1207_v0 = vpop.xlane.xlu1 %1206 }
 0x1e2   : > { %v1205_v47 = vpop.xlane.xlu0 %1204  ;;  %v2357_v59 = vpop.eup %2356  ;;  %v1637_v14 = vmul.f32 %v2355_v24, %v1445_v54  ;;  %v1511_v52 = vadd.f32 1e-05, %v1383_v55  ;;  %v1287_v23 = vmul.f32 0.020833334, %v1207_v0 }
 0x1e3   : > { %v1510_v39 = vadd.f32 1e-05, %v1382_v21  ;;  %v1636_v7 = vmul.f32 %v2357_v59, %v1444_v13  ;;  %v1286_v57 = vmul.f32 0.020833334, %v1205_v47 }
 0x1e4   : > { %v1706_v28 = vmul.f32 %v2923_v32, %v1637_v14  ;;  %2362 = vrsqrt.f32 %v1511_v52  ;;  %v1415_v50 = vsub.f32 %v1287_v23, %v1351_v49  ;;  %v3386_v32 = vld [vmem:[%s3800_s2 + $0x2] ss:$0 sm:$0xff] }
 0x1e5   : > { %v2359_v17 = vpop.eup %2358  ;;  %v1705_v10 = vmul.f32 %v3380_v37, %v1636_v7  ;;  %2364 = vrsqrt.f32 %v1510_v39  ;;  %v1414_v45 = vsub.f32 %v1286_v57, %v1350_v27  ;;  %v891_v11 = vpop.xlane.xlu1 %890 }
 0x1e6   : > { %v889_v36 = vpop.xlane.xlu0 %888  ;;  %v2361_v30 = vpop.eup %2360  ;;  %v1775_v31 = vadd.f32 %v3386_v32, %v1706_v28  ;;  %v1669_v4 = vmul.f32 %v2359_v17, %v1477_v34  ;;  %v1543_v56 = vadd.f32 1e-05, %v1415_v50  ;;  %v3396_v49 = vmul.f32 0.020833334, %v891_v11 }
 0x1e7   : > { %v1774_v19 = vadd.f32 %v3386_v32, %v1705_v10  ;;  %v1668_v62 = vmul.f32 %v2361_v30, %v1476_v61  ;;  %v1542_v60 = vadd.f32 1e-05, %v1414_v45  ;;  %v3398_v0 = vmul.f32 0.020833334, %v889_v36 }
 0x1e8   : > { %v1847_v3 = vadd.f32 %v3119_v16, %v1775_v31  ;;  %v1738_v1 = vmul.f32 %v3380_v37, %v1669_v4  ;;  %2366 = vrsqrt.f32 %v1543_v56  ;;  %v1321_v7 = vmul.f32 %v3396_v49, %v3396_v49 }
 0x1e9   : > { %v1846_v54 = vadd.f32 %v3126_v18, %v1774_v19  ;;  %v1737_v55 = vmul.f32 %v3380_v37, %v1668_v62  ;;  %2368 = vrsqrt.f32 %v1542_v60  ;;  %v955_v21 = vpop.xlane.xlu1 %954  ;;  %v1320_v27 = vmul.f32 %v3398_v0, %v3398_v0 }
 0x1ea   : > { %v953_v24 = vpop.xlane.xlu0 %952  ;;  %1911 = vst [vmem:[%s2964_s21 + $0x71] sm:$0xff] %v1847_v3  ;;  %v1807_v13 = vadd.f32 %v3386_v32, %v1738_v1  ;;  %v3404_v52 = vmul.f32 0.020833334, %v955_v21  ;;  %v1446_v61 = vsub.f32 %v2818_v44, %v3348_v8  ;;  %v1479_v62 = vsub.f32 %v2823_v48, %v3354_v46 }
 0x1eb   : > { %1910 = vst [vmem:[%s2964_s21 + $0x69] sm:$0xff] %v1846_v54  ;;  %v1806_v47 = vadd.f32 %v3386_v32, %v1737_v55  ;;  %v3412_v28 = vmul.f32 0.020833334, %v953_v24  ;;  %v1478_v3 = vsub.f32 %v2826_v51, %v3362_v22 }
 0x1ec   : > { %v1879_v59 = vadd.f32 %v3119_v16, %v1807_v13  ;;  %v1447_v16 = vsub.f32 %v2815_v43, %v3346_v58  ;;  %v1353_v10 = vmul.f32 %v3404_v52, %v3404_v52 }
 0x1ed   : > { %v1878_v14 = vadd.f32 %v3126_v18, %v1806_v47  ;;  %v1147_v39 = vpop.xlane.xlu1 %1146  ;;  %v1352_v43 = vmul.f32 %v3412_v28, %v3412_v28 }
 0x1ee   : > { %v1145_v23 = vpop.xlane.xlu0 %1144  ;;  %1943 = vst [vmem:[%s2964_s21 + $0x191] sm:$0xff] %v1879_v59  ;;  %v1257_v57 = vmul.f32 0.020833334, %v1147_v39 }
 0x1ef   : > { %v1256_v34 = vmul.f32 0.020833334, %v1145_v23  ;;  %1942 = vst [vmem:[%s2964_s21 + $0x189] sm:$0xff] %v1878_v14 }
 0x1f0   : > { %v1385_v18 = vsub.f32 %v1257_v57, %v1321_v7 }
 0x1f1   : > { %v1384_v50 = vsub.f32 %v1256_v34, %v1320_v27  ;;  %v2363_v17 = vpop.eup %2362  ;;  %v1211_v45 = vpop.xlane.xlu1 %1210 }
 0x1f2   : > { %v2365_v11 = vpop.eup %2364  ;;  %v1639_v36 = vmul.f32 %v2363_v17, %v1447_v16  ;;  %v1513_v30 = vadd.f32 1e-05, %v1385_v18  ;;  %v1289_v4 = vmul.f32 0.020833334, %v1211_v45  ;;  %v1209_v56 = vpop.xlane.xlu0 %1208 }
 0x1f3   : > { %v1512_v31 = vadd.f32 1e-05, %v1384_v50  ;;  %v1638_v19 = vmul.f32 %v2365_v11, %v1446_v61  ;;  %v1288_v58 = vmul.f32 0.020833334, %v1209_v56 }
 0x1f4   : > { %v1708_v44 = vmul.f32 %v3380_v37, %v1639_v36  ;;  %2370 = vrsqrt.f32 %v1513_v30  ;;  %v1417_v8 = vsub.f32 %v1289_v4, %v1353_v10  ;;  %v1449_v4 = vsub.f32 %v2839_v63, %v3396_v49 }
 0x1f5   : > { %v2367_v60 = vpop.eup %2366  ;;  %v1707_v1 = vmul.f32 %v3380_v37, %v1638_v19  ;;  %2372 = vrsqrt.f32 %v1512_v31  ;;  %v1416_v54 = vsub.f32 %v1288_v58, %v1352_v43  ;;  %v895_v55 = vpop.xlane.xlu1 %894  ;;  %v1962_v31 = vld [vmem:[%s3800_s2 + $0x3] sm:$0x1] }
 0x1f6   : > { %v2369_v21 = vpop.eup %2368  ;;  %v1777_v24 = vadd.f32 %v3386_v32, %v1708_v44  ;;  %v1671_v13 = vmul.f32 %v2367_v60, %v1479_v62  ;;  %v1545_v47 = vadd.f32 1e-05, %v1417_v8  ;;  %v893_v48 = vpop.xlane.xlu0 %892  ;;  %v3436_v57 = vmul.f32 0.020833334, %v895_v55  ;;  %1963 = vst [vmem:[%s2964_s21] sm:$0x1] %v1962_v31  ;;  %v3835_v43 = vld [vmem:[#allocation2_spill] sm:$0xff] }
 0x1f7   : > { %v1776_v46 = vadd.f32 %v3386_v32, %v1707_v1  ;;  %v1670_v59 = vmul.f32 %v2369_v21, %v1478_v3  ;;  %v1544_v14 = vadd.f32 1e-05, %v1416_v54  ;;  %v3440_v18 = vmul.f32 0.020833334, %v893_v48  ;;  %1964 = vst [vmem:[%s2964_s21 + $0x48] sm:$0x1] %v1962_v31 }
 0x1f8   : > { %v1849_v39 = vadd.f32 %v3193_v20, %v1777_v24  ;;  %v1740_v51 = vmul.f32 %v3380_v37, %v1671_v13  ;;  %2374 = vrsqrt.f32 %v1545_v47  ;;  %v1323_v10 = vmul.f32 %v3436_v57, %v3436_v57  ;;  %1965 = vst [vmem:[%s2964_s21 + $0x90] sm:$0x1] %v1962_v31  ;;  %1966 = vst [vmem:[%s2964_s21 + $0xd8] sm:$0x1] %v1962_v31  ;;  %v3836_v13 = vld [vmem:[#allocation3_spill] sm:$0xff] }
 0x1f9   : > { %v1848_v22 = vadd.f32 %v3200_v6, %v1776_v46  ;;  %v1739_v23 = vmul.f32 %v3380_v37, %v1670_v59  ;;  %2376 = vrsqrt.f32 %v1544_v14  ;;  %v959_v7 = vpop.xlane.xlu1 %958  ;;  %1967 = vst [vmem:[%s2964_s21 + $0x120] sm:$0x1] %v1962_v31  ;;  %1968 = vst [vmem:[%s2964_s21 + $0x168] sm:$0x1] %v1962_v31  ;;  %v1448_v58 = vsub.f32 %v3835_v43, %v3398_v0  ;;  %v3837_v59 = vld [vmem:[#allocation4_spill] sm:$0xff] }
 0x1fa   : > { %1913 = vst [vmem:[%s2964_s21 + $0x81] sm:$0xff] %v1849_v39  ;;  %v1809_v27 = vadd.f32 %v3386_v32, %v1740_v51  ;;  %v957_v34 = vpop.xlane.xlu0 %956  ;;  %v3447_v45 = vmul.f32 0.020833334, %v959_v7  ;;  %1969 = vst [vmem:[%s2964_s21 + $0x1b0] sm:$0x1] %v1962_v31  ;;  %v1481_v47 = vsub.f32 %v3836_v13, %v3404_v52  ;;  %v1480_v14 = vsub.f32 %v3837_v59, %v3412_v28  ;;  %v3484_v28 = vld [vmem:[%s3801_s3 + $0x8] sm:$0xff] }
 0x1fb   : > { %1912 = vst [vmem:[%s2964_s21 + $0x79] sm:$0xff] %v1848_v22  ;;  %v1808_v16 = vadd.f32 %v3386_v32, %v1739_v23  ;;  %1970 = vst [vmem:[%s2964_s21 + $0x1f8] sm:$0x1] %v1962_v31 }
 0x1fc   : > { %v1881_v50 = vadd.f32 %v3193_v20, %v1809_v27  ;;  %v1322_v20 = vmul.f32 %v3440_v18, %v3440_v18  ;;  %v1355_v63 = vmul.f32 %v3447_v45, %v3447_v45 }
 0x1fd   : > { %v1880_v17 = vadd.f32 %v3200_v6, %v1808_v16  ;;  %v1151_v61 = vpop.xlane.xlu1 %1150  ;;  %v3452_v6 = vmul.f32 0.020833334, %v957_v34 }
 0x1fe   : > { %1945 = vst [vmem:[%s2964_s21 + $0x1a1] sm:$0xff] %v1881_v50  ;;  %v1259_v11 = vmul.f32 0.020833334, %v1151_v61  ;;  %v1149_v36 = vpop.xlane.xlu0 %1148 }
 0x1ff   : > { %1944 = vst [vmem:[%s2964_s21 + $0x199] sm:$0xff] %v1880_v17  ;;  %v1258_v30 = vmul.f32 0.020833334, %v1149_v36  ;;  %v1354_v55 = vmul.f32 %v3452_v6, %v3452_v6 }
 0x200   : > { %v1387_v56 = vsub.f32 %v1259_v11, %v1323_v10  ;;  %v3491_v11 = vld [vmem:[%s3801_s3] sm:$0xff] }
 0x201   : > { %v2371_v19 = vpop.eup %2370  ;;  %v1386_v62 = vsub.f32 %v1258_v30, %v1322_v20  ;;  %v1215_v44 = vpop.xlane.xlu1 %1214 }
 0x202   : > { %v2373_v8 = vpop.eup %2372  ;;  %v1641_v60 = vmul.f32 %v2371_v19, %v1449_v4  ;;  %v1515_v49 = vadd.f32 1e-05, %v1387_v56  ;;  %v1291_v3 = vmul.f32 0.020833334, %v1215_v44  ;;  %v1213_v1 = vpop.xlane.xlu0 %1212 }
 0x203   : > { %v1640_v54 = vmul.f32 %v2373_v8, %v1448_v58  ;;  %v1514_v21 = vadd.f32 1e-05, %v1386_v62  ;;  %v1290_v24 = vmul.f32 0.020833334, %v1213_v1 }
 0x204   : > { %v1710_v0 = vmul.f32 %v3380_v37, %v1641_v60  ;;  %2378 = vrsqrt.f32 %v1515_v49  ;;  %v1419_v48 = vsub.f32 %v1291_v3, %v1355_v63 }
 0x205   : > { %v2375_v46 = vpop.eup %2374  ;;  %v1709_v39 = vmul.f32 %v3380_v37, %v1640_v54  ;;  %2380 = vrsqrt.f32 %v1514_v21  ;;  %v1418_v51 = vsub.f32 %v1290_v24, %v1354_v55  ;;  %v899_v22 = vpop.xlane.xlu1 %898  ;;  %v3838_v55 = vld [vmem:[#allocation5_spill] sm:$0xff] }
 0x206   : > { %v2377_v23 = vpop.eup %2376  ;;  %v1779_v7 = vadd.f32 %v3386_v32, %v1710_v0  ;;  %v1673_v27 = vmul.f32 %v2375_v46, %v1481_v47  ;;  %v1547_v34 = vadd.f32 1e-05, %v1419_v48  ;;  %v897_v52 = vpop.xlane.xlu0 %896  ;;  %v3497_v4 = vmul.f32 0.020833334, %v899_v22  ;;  %v3839_v47 = vld [vmem:[#allocation6_spill] sm:$0xff] }
 0x207   : > { %v1778_v16 = vadd.f32 %v3386_v32, %v1709_v39  ;;  %v1672_v50 = vmul.f32 %v2377_v23, %v1480_v14  ;;  %v1546_v17 = vadd.f32 1e-05, %v1418_v51  ;;  %v3501_v43 = vmul.f32 0.020833334, %v897_v52  ;;  %v3840_v52 = vld [vmem:[#allocation7_spill] sm:$0xff] }
 0x208   : > { %v1851_v61 = vadd.f32 %v3484_v28, %v1779_v7  ;;  %v1742_v10 = vmul.f32 %v3380_v37, %v1673_v27  ;;  %2382 = vrsqrt.f32 %v1547_v34  ;;  %v1325_v8 = vmul.f32 %v3497_v4, %v3497_v4 }
 0x209   : > { %v1850_v36 = vadd.f32 %v3491_v11, %v1778_v16  ;;  %v1741_v20 = vmul.f32 %v3380_v37, %v1672_v50  ;;  %2384 = vrsqrt.f32 %v1546_v17  ;;  %v963_v30 = vpop.xlane.xlu1 %962  ;;  %v1324_v3 = vmul.f32 %v3501_v43, %v3501_v43 }
 0x20a   : > { %1915 = vst [vmem:[%s2964_s21 + $0x99] sm:$0xff] %v1851_v61  ;;  %v1811_v31 = vadd.f32 %v3386_v32, %v1742_v10  ;;  %v961_v56 = vpop.xlane.xlu0 %960  ;;  %v3508_v60 = vmul.f32 0.020833334, %v963_v30  ;;  %v1451_v21 = vsub.f32 %v3838_v55, %v3436_v57  ;;  %v1450_v0 = vsub.f32 %v3839_v47, %v3440_v18  ;;  %v3841_v61 = vld [vmem:[#allocation8_spill] sm:$0xff] }
 0x20b   : > { %1914 = vst [vmem:[%s2964_s21 + $0x91] sm:$0xff] %v1850_v36  ;;  %v1810_v19 = vadd.f32 %v3386_v32, %v1741_v20  ;;  %v3513_v1 = vmul.f32 0.020833334, %v961_v56  ;;  %v1483_v16 = vsub.f32 %v3840_v52, %v3447_v45  ;;  %v1482_v10 = vsub.f32 %v3841_v61, %v3452_v6  ;;  %v3534_v6 = vld [vmem:[%s3801_s3 + $0x18] sm:$0xff] }
 0x20c   : > { %v1883_v58 = vadd.f32 %v3484_v28, %v1811_v31  ;;  %v1357_v39 = vmul.f32 %v3508_v60, %v3508_v60 }
 0x20d   : > { %v1882_v62 = vadd.f32 %v3491_v11, %v1810_v19  ;;  %v1155_v44 = vpop.xlane.xlu1 %1154  ;;  %v1356_v27 = vmul.f32 %v3513_v1, %v3513_v1 }
 0x20e   : > { %1947 = vst [vmem:[%s2964_s21 + $0x1b9] sm:$0xff] %v1883_v58  ;;  %v1261_v63 = vmul.f32 0.020833334, %v1155_v44  ;;  %v1153_v49 = vpop.xlane.xlu0 %1152 }
 0x20f   : > { %1946 = vst [vmem:[%s2964_s21 + $0x1b1] sm:$0xff] %v1882_v62  ;;  %v1260_v54 = vmul.f32 0.020833334, %v1153_v49 }
 0x210   : > { %v1389_v24 = vsub.f32 %v1261_v63, %v1325_v8 }
 0x211   : > { %v2379_v13 = vpop.eup %2378  ;;  %v1388_v48 = vsub.f32 %v1260_v54, %v1324_v3  ;;  %v1219_v46 = vpop.xlane.xlu1 %1218  ;;  %v3541_v3 = vld [vmem:[%s3801_s3 + $0x10] sm:$0xff] }
 0x212   : > { %v2381_v59 = vpop.eup %2380  ;;  %v1643_v14 = vmul.f32 %v2379_v13, %v1451_v21  ;;  %v1517_v51 = vadd.f32 1e-05, %v1389_v24  ;;  %v1293_v22 = vmul.f32 0.020833334, %v1219_v46  ;;  %v1217_v23 = vpop.xlane.xlu0 %1216 }
 0x213   : > { %v1642_v7 = vmul.f32 %v2381_v59, %v1450_v0  ;;  %v1516_v57 = vadd.f32 1e-05, %v1388_v48  ;;  %v1292_v34 = vmul.f32 0.020833334, %v1217_v23 }
 0x214   : > { %v1712_v18 = vmul.f32 %v3380_v37, %v1643_v14  ;;  %2386 = vrsqrt.f32 %v1517_v51  ;;  %v1421_v50 = vsub.f32 %v1293_v22, %v1357_v39 }
 0x215   : > { %v2383_v17 = vpop.eup %2382  ;;  %v1711_v36 = vmul.f32 %v3380_v37, %v1642_v7  ;;  %2388 = vrsqrt.f32 %v1516_v57  ;;  %v1420_v20 = vsub.f32 %v1292_v34, %v1356_v27  ;;  %v903_v30 = vpop.xlane.xlu1 %902  ;;  %v3842_v34 = vld [vmem:[#allocation9_spill] sm:$0xff] }
 0x216   : > { %v2385_v31 = vpop.eup %2384  ;;  %v1781_v56 = vadd.f32 %v3386_v32, %v1712_v18  ;;  %v1675_v19 = vmul.f32 %v2383_v17, %v1483_v16  ;;  %v1549_v58 = vadd.f32 1e-05, %v1421_v50  ;;  %v901_v45 = vpop.xlane.xlu0 %900  ;;  %v3547_v13 = vmul.f32 0.020833334, %v903_v30  ;;  %v3843_v50 = vld [vmem:[#allocation10_spill] sm:$0xff] }
 0x217   : > { %v1780_v62 = vadd.f32 %v3386_v32, %v1711_v36  ;;  %v1674_v44 = vmul.f32 %v2385_v31, %v1482_v10  ;;  %v1548_v8 = vadd.f32 1e-05, %v1420_v20  ;;  %v3551_v48 = vmul.f32 0.020833334, %v901_v45 }
 0x218   : > { %v1853_v63 = vadd.f32 %v3534_v6, %v1781_v56  ;;  %v1744_v49 = vmul.f32 %v3380_v37, %v1675_v19  ;;  %2390 = vrsqrt.f32 %v1549_v58  ;;  %v1327_v39 = vmul.f32 %v3547_v13, %v3547_v13 }
 0x219   : > { %v1852_v54 = vadd.f32 %v3541_v3, %v1780_v62  ;;  %v1743_v55 = vmul.f32 %v3380_v37, %v1674_v44  ;;  %2392 = vrsqrt.f32 %v1548_v8  ;;  %v967_v21 = vpop.xlane.xlu1 %966  ;;  %v1326_v7 = vmul.f32 %v3551_v48, %v3551_v48 }
 0x21a   : > { %1917 = vst [vmem:[%s2964_s21 + $0xa9] sm:$0xff] %v1853_v63  ;;  %v1813_v24 = vadd.f32 %v3386_v32, %v1744_v49  ;;  %v965_v47 = vpop.xlane.xlu0 %964  ;;  %v3558_v51 = vmul.f32 0.020833334, %v967_v21  ;;  %v1453_v52 = vsub.f32 %v3842_v34, %v3497_v4  ;;  %v1452_v17 = vsub.f32 %v3843_v50, %v3501_v43  ;;  %v3844_v49 = vld [vmem:[#allocation11_spill] sm:$0xff] }
 0x21b   : > { %1916 = vst [vmem:[%s2964_s21 + $0xa1] sm:$0xff] %v1852_v54  ;;  %v1812_v0 = vadd.f32 %v3386_v32, %v1743_v55  ;;  %v3563_v27 = vmul.f32 0.020833334, %v965_v47  ;;  %v1485_v44 = vsub.f32 %v2928_v53, %v3508_v60  ;;  %v1484_v54 = vsub.f32 %v3844_v49, %v3513_v1  ;;  %v3584_v1 = vld [vmem:[%s3801_s3 + $0x28] sm:$0xff] }
 0x21c   : > { %v1885_v46 = vadd.f32 %v3534_v6, %v1813_v24  ;;  %v1359_v30 = vmul.f32 %v3558_v51, %v3558_v51 }
 0x21d   : > { %v1884_v59 = vadd.f32 %v3541_v3, %v1812_v0  ;;  %v1159_v14 = vpop.xlane.xlu1 %1158  ;;  %v1358_v45 = vmul.f32 %v3563_v27, %v3563_v27 }
 0x21e   : > { %1949 = vst [vmem:[%s2964_s21 + $0x1c9] sm:$0xff] %v1885_v46  ;;  %v1263_v22 = vmul.f32 0.020833334, %v1159_v14  ;;  %v1157_v23 = vpop.xlane.xlu0 %1156 }
 0x21f   : > { %1948 = vst [vmem:[%s2964_s21 + $0x1c1] sm:$0xff] %v1884_v59  ;;  %v1262_v57 = vmul.f32 0.020833334, %v1157_v23 }
 0x220   : > { %v1391_v16 = vsub.f32 %v1263_v22, %v1327_v39 }
 0x221   : > { %v2387_v18 = vpop.eup %2386  ;;  %v1390_v61 = vsub.f32 %v1262_v57, %v1326_v7  ;;  %v1223_v10 = vpop.xlane.xlu1 %1222  ;;  %v3591_v7 = vld [vmem:[%s3801_s3 + $0x20] sm:$0xff] }
 0x222   : > { %v2389_v36 = vpop.eup %2388  ;;  %v1645_v20 = vmul.f32 %v2387_v18, %v1453_v52  ;;  %v1519_v31 = vadd.f32 1e-05, %v1391_v16  ;;  %v1295_v56 = vmul.f32 0.020833334, %v1223_v10  ;;  %v1221_v19 = vpop.xlane.xlu0 %1220 }
 0x223   : > { %v1644_v58 = vmul.f32 %v2389_v36, %v1452_v17  ;;  %v1518_v4 = vadd.f32 1e-05, %v1390_v61  ;;  %v1294_v62 = vmul.f32 0.020833334, %v1221_v19 }
 0x224   : > { %v1714_v43 = vmul.f32 %v3380_v37, %v1645_v20  ;;  %2394 = vrsqrt.f32 %v1519_v31  ;;  %v1423_v8 = vsub.f32 %v1295_v56, %v1359_v30 }
 0x225   : > { %v2391_v63 = vpop.eup %2390  ;;  %v1713_v55 = vmul.f32 %v3380_v37, %v1644_v58  ;;  %2396 = vrsqrt.f32 %v1518_v4  ;;  %v1422_v21 = vsub.f32 %v1294_v62, %v1358_v45  ;;  %v907_v24 = vpop.xlane.xlu1 %906  ;;  %v3845_v62 = vld [vmem:[#allocation12_spill] sm:$0xff] }
 0x226   : > { %v2393_v47 = vpop.eup %2392  ;;  %v1783_v0 = vadd.f32 %v3386_v32, %v1714_v43  ;;  %v1677_v46 = vmul.f32 %v2391_v63, %v1485_v44  ;;  %v1551_v59 = vadd.f32 1e-05, %v1423_v8  ;;  %v905_v53 = vpop.xlane.xlu0 %904  ;;  %v3597_v18 = vmul.f32 0.020833334, %v907_v24 }
 0x227   : > { %v1782_v60 = vadd.f32 %v3386_v32, %v1713_v55  ;;  %v1676_v14 = vmul.f32 %v2393_v47, %v1484_v54  ;;  %v1550_v39 = vadd.f32 1e-05, %v1422_v21  ;;  %v3601_v61 = vmul.f32 0.020833334, %v905_v53 }
 0x228   : > { %v1855_v22 = vadd.f32 %v3584_v1, %v1783_v0  ;;  %v1746_v23 = vmul.f32 %v3380_v37, %v1677_v46  ;;  %2398 = vrsqrt.f32 %v1551_v59  ;;  %v1329_v30 = vmul.f32 %v3597_v18, %v3597_v18 }
 0x229   : > { %v1854_v57 = vadd.f32 %v3591_v7, %v1782_v60  ;;  %v1745_v34 = vmul.f32 %v3380_v37, %v1676_v14  ;;  %2400 = vrsqrt.f32 %v1550_v39  ;;  %v971_v52 = vpop.xlane.xlu1 %970  ;;  %v1328_v58 = vmul.f32 %v3601_v61, %v3601_v61 }
 0x22a   : > { %1919 = vst [vmem:[%s2964_s21 + $0xb9] sm:$0xff] %v1855_v22  ;;  %v1815_v16 = vadd.f32 %v3386_v32, %v1746_v23  ;;  %v969_v50 = vpop.xlane.xlu0 %968  ;;  %v3608_v31 = vmul.f32 0.020833334, %v971_v52  ;;  %v1455_v44 = vsub.f32 %v3845_v62, %v3547_v13  ;;  %v1454_v63 = vsub.f32 %v2999_v40, %v3551_v48 }
 0x22b   : > { %1918 = vst [vmem:[%s2964_s21 + $0xb1] sm:$0xff] %v1854_v57  ;;  %v1814_v17 = vadd.f32 %v3386_v32, %v1745_v34  ;;  %v3613_v45 = vmul.f32 0.020833334, %v969_v50  ;;  %v1487_v14 = vsub.f32 %v3007_v5, %v3558_v51  ;;  %v1486_v22 = vsub.f32 %v3019_v29, %v3563_v27  ;;  %v3634_v29 = vld [vmem:[%s3801_s3 + $0x38] sm:$0xff] }
 0x22c   : > { %v1887_v10 = vadd.f32 %v3584_v1, %v1815_v16  ;;  %v1361_v24 = vmul.f32 %v3608_v31, %v3608_v31 }
 0x22d   : > { %v1886_v36 = vadd.f32 %v3591_v7, %v1814_v17  ;;  %v1163_v20 = vpop.xlane.xlu1 %1162  ;;  %v1360_v53 = vmul.f32 %v3613_v45, %v3613_v45 }
 0x22e   : > { %1951 = vst [vmem:[%s2964_s21 + $0x1d9] sm:$0xff] %v1887_v10  ;;  %v1265_v56 = vmul.f32 0.020833334, %v1163_v20  ;;  %v1161_v19 = vpop.xlane.xlu0 %1160 }
 0x22f   : > { %1950 = vst [vmem:[%s2964_s21 + $0x1d1] sm:$0xff] %v1886_v36  ;;  %v1264_v4 = vmul.f32 0.020833334, %v1161_v19 }
 0x230   : > { %v1393_v43 = vsub.f32 %v1265_v56, %v1329_v30  ;;  %v3641_v30 = vld [vmem:[%s3801_s3 + $0x30] sm:$0xff] }
 0x231   : > { %v2395_v8 = vpop.eup %2394  ;;  %v1392_v49 = vsub.f32 %v1264_v4, %v1328_v58  ;;  %v1227_v54 = vpop.xlane.xlu1 %1226 }
 0x232   : > { %v2397_v55 = vpop.eup %2396  ;;  %v1647_v21 = vmul.f32 %v2395_v8, %v1455_v44  ;;  %v1521_v47 = vadd.f32 1e-05, %v1393_v43  ;;  %v1297_v0 = vmul.f32 0.020833334, %v1227_v54  ;;  %v1225_v46 = vpop.xlane.xlu0 %1224 }
 0x233   : > { %v1646_v59 = vmul.f32 %v2397_v55, %v1454_v63  ;;  %v1520_v13 = vadd.f32 1e-05, %v1392_v49  ;;  %v1296_v60 = vmul.f32 0.020833334, %v1225_v46 }
 0x234   : > { %v1716_v40 = vmul.f32 %v3380_v37, %v1647_v21  ;;  %2402 = vrsqrt.f32 %v1521_v47  ;;  %v1425_v48 = vsub.f32 %v1297_v0, %v1361_v24 }
 0x235   : > { %v2399_v39 = vpop.eup %2398  ;;  %v1715_v23 = vmul.f32 %v3380_v37, %v1646_v59  ;;  %2404 = vrsqrt.f32 %v1520_v13  ;;  %v1424_v57 = vsub.f32 %v1296_v60, %v1360_v53  ;;  %v911_v34 = vpop.xlane.xlu1 %910  ;;  %v3846_v53 = vld [vmem:[#allocation13_spill] sm:$0xff] }
 0x236   : > { %v2401_v52 = vpop.eup %2400  ;;  %v1785_v16 = vadd.f32 %v3386_v32, %v1716_v40  ;;  %v1679_v50 = vmul.f32 %v2399_v39, %v1487_v14  ;;  %v1553_v17 = vadd.f32 1e-05, %v1425_v48  ;;  %v909_v5 = vpop.xlane.xlu0 %908  ;;  %v3647_v62 = vmul.f32 0.020833334, %v911_v34 }
 0x237   : > { %v1784_v51 = vadd.f32 %v3386_v32, %v1715_v23  ;;  %v1678_v10 = vmul.f32 %v2401_v52, %v1486_v22  ;;  %v1552_v36 = vadd.f32 1e-05, %v1424_v57  ;;  %v3651_v8 = vmul.f32 0.020833334, %v909_v5 }
 0x238   : > { %v1857_v27 = vadd.f32 %v3634_v29, %v1785_v16  ;;  %v1748_v20 = vmul.f32 %v3380_v37, %v1679_v50  ;;  %2406 = vrsqrt.f32 %v1553_v17  ;;  %v1331_v55 = vmul.f32 %v3647_v62, %v3647_v62 }
 0x239   : > { %v1856_v56 = vadd.f32 %v3641_v30, %v1784_v51  ;;  %v1747_v19 = vmul.f32 %v3380_v37, %v1678_v10  ;;  %2408 = vrsqrt.f32 %v1552_v36  ;;  %v975_v58 = vpop.xlane.xlu1 %974  ;;  %v1330_v0 = vmul.f32 %v3651_v8, %v3651_v8 }
 0x23a   : > { %1921 = vst [vmem:[%s2964_s21 + $0xc9] sm:$0xff] %v1857_v27  ;;  %v1817_v4 = vadd.f32 %v3386_v32, %v1748_v20  ;;  %v973_v44 = vpop.xlane.xlu0 %972  ;;  %v3658_v21 = vmul.f32 0.020833334, %v975_v58  ;;  %v1457_v13 = vsub.f32 %v3846_v53, %v3597_v18  ;;  %v1456_v40 = vsub.f32 %v3074_v2, %v3601_v61 }
 0x23b   : > { %1920 = vst [vmem:[%s2964_s21 + $0xc1] sm:$0xff] %v1856_v56  ;;  %v1816_v43 = vadd.f32 %v3386_v32, %v1747_v19  ;;  %v3663_v46 = vmul.f32 0.020833334, %v973_v44  ;;  %v1489_v51 = vsub.f32 %v3082_v42, %v3608_v31  ;;  %v1488_v36 = vsub.f32 %v3094_v25, %v3613_v45 }
 0x23c   : > { %v1889_v63 = vadd.f32 %v3634_v29, %v1817_v4  ;;  %v1363_v57 = vmul.f32 %v3658_v21, %v3658_v21 }
 0x23d   : > { %v1888_v49 = vadd.f32 %v3641_v30, %v1816_v43  ;;  %v1167_v54 = vpop.xlane.xlu1 %1166  ;;  %v1362_v17 = vmul.f32 %v3663_v46, %v3663_v46 }
 0x23e   : > { %1953 = vst [vmem:[%s2964_s21 + $0x1e9] sm:$0xff] %v1889_v63  ;;  %v1267_v24 = vmul.f32 0.020833334, %v1167_v54  ;;  %v1165_v47 = vpop.xlane.xlu0 %1164 }
 0x23f   : > { %1952 = vst [vmem:[%s2964_s21 + $0x1e1] sm:$0xff] %v1888_v49  ;;  %v1266_v59 = vmul.f32 0.020833334, %v1165_v47 }
 0x240   : > { %v1395_v60 = vsub.f32 %v1267_v24, %v1331_v55 }
 0x241   : > { %v2403_v14 = vpop.eup %2402  ;;  %v1394_v48 = vsub.f32 %v1266_v59, %v1330_v0  ;;  %v1231_v39 = vpop.xlane.xlu1 %1230 }
 0x242   : > { %v2405_v22 = vpop.eup %2404  ;;  %v1649_v23 = vmul.f32 %v2403_v14, %v1457_v13  ;;  %v1523_v34 = vadd.f32 1e-05, %v1395_v60  ;;  %v1299_v52 = vmul.f32 0.020833334, %v1231_v39  ;;  %v1229_v16 = vpop.xlane.xlu0 %1228 }
 0x243   : > { %v1648_v50 = vmul.f32 %v2405_v22, %v1456_v40  ;;  %v1522_v18 = vadd.f32 1e-05, %v1394_v48  ;;  %v1298_v5 = vmul.f32 0.020833334, %v1229_v16 }
 0x244   : > { %v1718_v2 = vmul.f32 %v3380_v37, %v1649_v23  ;;  %2410 = vrsqrt.f32 %v1523_v34  ;;  %v1427_v61 = vsub.f32 %v1299_v52, %v1363_v57 }
 0x245   : > { %v2407_v10 = vpop.eup %2406  ;;  %v1717_v27 = vmul.f32 %v3380_v37, %v1648_v50  ;;  %2412 = vrsqrt.f32 %v1522_v18  ;;  %v1426_v20 = vsub.f32 %v1298_v5, %v1362_v17  ;;  %v915_v56 = vpop.xlane.xlu1 %914  ;;  %v1458_v50 = vsub.f32 %v3149_v38, %v3651_v8 }
 0x246   : > { %v2409_v19 = vpop.eup %2408  ;;  %v1787_v58 = vadd.f32 %v3386_v32, %v1718_v2  ;;  %v1681_v4 = vmul.f32 %v2407_v10, %v1489_v51  ;;  %v1555_v44 = vadd.f32 1e-05, %v1427_v61  ;;  %v913_v42 = vpop.xlane.xlu0 %912  ;;  %v3687_v47 = vmul.f32 0.020833334, %v915_v56 }
 0x247   : > { %v1786_v31 = vadd.f32 %v3386_v32, %v1717_v27  ;;  %v1680_v43 = vmul.f32 %v2409_v19, %v1488_v36  ;;  %v1554_v63 = vadd.f32 1e-05, %v1426_v20  ;;  %v3691_v53 = vmul.f32 0.020833334, %v913_v42  ;;  %v3848_v19 = vld [vmem:[#allocation15_spill] sm:$0xff] }
 0x248   : > { %v1859_v49 = vadd.f32 %v3484_v28, %v1787_v58  ;;  %v1750_v25 = vmul.f32 %v3380_v37, %v1681_v4  ;;  %2414 = vrsqrt.f32 %v1555_v44  ;;  %v1333_v40 = vmul.f32 %v3687_v47, %v3687_v47  ;;  %v3849_v44 = vld [vmem:[#allocation16_spill] sm:$0xff] }
 0x249   : > { %v1858_v45 = vadd.f32 %v3491_v11, %v1786_v31  ;;  %v1749_v54 = vmul.f32 %v3380_v37, %v1680_v43  ;;  %2416 = vrsqrt.f32 %v1554_v63  ;;  %v979_v55 = vpop.xlane.xlu1 %978  ;;  %v1332_v23 = vmul.f32 %v3691_v53, %v3691_v53 }
 0x24a   : > { %1923 = vst [vmem:[%s2964_s21 + $0xe1] sm:$0xff] %v1859_v49  ;;  %v1819_v24 = vadd.f32 %v3386_v32, %v1750_v25  ;;  %v977_v0 = vpop.xlane.xlu0 %976  ;;  %v3698_v48 = vmul.f32 0.020833334, %v979_v55  ;;  %v1491_v58 = vsub.f32 %v3848_v19, %v3658_v21  ;;  %v1490_v42 = vsub.f32 %v3849_v44, %v3663_v46 }
 0x24b   : > { %1922 = vst [vmem:[%s2964_s21 + $0xd9] sm:$0xff] %v1858_v45  ;;  %v1818_v59 = vadd.f32 %v3386_v32, %v1749_v54  ;;  %v3703_v57 = vmul.f32 0.020833334, %v977_v0 }
 0x24c   : > { %v1891_v13 = vadd.f32 %v3484_v28, %v1819_v24  ;;  %v3847_v28 = vld [vmem:[#allocation14_spill] sm:$0xff]  ;;  %v1365_v2 = vmul.f32 %v3698_v48, %v3698_v48 }
 0x24d   : > { %v1890_v60 = vadd.f32 %v3491_v11, %v1818_v59  ;;  %v1171_v14 = vpop.xlane.xlu1 %1170  ;;  %v1459_v52 = vsub.f32 %v3847_v28, %v3647_v62  ;;  %v1364_v20 = vmul.f32 %v3703_v57, %v3703_v57 }
 0x24e   : > { %1955 = vst [vmem:[%s2964_s21 + $0x201] sm:$0xff] %v1891_v13  ;;  %v1269_v39 = vmul.f32 0.020833334, %v1171_v14  ;;  %v1169_v22 = vpop.xlane.xlu0 %1168 }
 0x24f   : > { %1954 = vst [vmem:[%s2964_s21 + $0x1f9] sm:$0xff] %v1890_v60  ;;  %v1268_v34 = vmul.f32 0.020833334, %v1169_v22 }
 0x250   : > { %v1397_v11 = vsub.f32 %v1269_v39, %v1333_v40 }
 0x251   : > { %v2411_v16 = vpop.eup %2410  ;;  %v1396_v17 = vsub.f32 %v1268_v34, %v1332_v23  ;;  %v1235_v18 = vpop.xlane.xlu1 %1234 }
 0x252   : > { %v2413_v5 = vpop.eup %2412  ;;  %v1651_v51 = vmul.f32 %v2411_v16, %v1459_v52  ;;  %v1525_v61 = vadd.f32 1e-05, %v1397_v11  ;;  %v1301_v10 = vmul.f32 0.020833334, %v1235_v18  ;;  %v1233_v36 = vpop.xlane.xlu0 %1232 }
 0x253   : > { %v1650_v27 = vmul.f32 %v2413_v5, %v1458_v50  ;;  %v1524_v62 = vadd.f32 1e-05, %v1396_v17  ;;  %v1300_v56 = vmul.f32 0.020833334, %v1233_v36  ;;  %v1460_v36 = vsub.f32 %v3228_v9, %v3691_v53 }
 0x254   : > { %v1720_v38 = vmul.f32 %v3380_v37, %v1651_v51  ;;  %2418 = vrsqrt.f32 %v1525_v61  ;;  %v1429_v8 = vsub.f32 %v1301_v10, %v1365_v2 }
 0x255   : > { %v2415_v4 = vpop.eup %2414  ;;  %v1719_v31 = vmul.f32 %v3380_v37, %v1650_v27  ;;  %2420 = vrsqrt.f32 %v1524_v62  ;;  %v1428_v43 = vsub.f32 %v1300_v56, %v1364_v20  ;;  %v919_v63 = vpop.xlane.xlu1 %918 }
 0x256   : > { %v2417_v49 = vpop.eup %2416  ;;  %v1789_v25 = vadd.f32 %v3386_v32, %v1720_v38  ;;  %v1683_v45 = vmul.f32 %v2415_v4, %v1491_v58  ;;  %v1557_v54 = vadd.f32 1e-05, %v1429_v8  ;;  %v917_v21 = vpop.xlane.xlu0 %916  ;;  %v3727_v39 = vmul.f32 0.020833334, %v919_v63 }
 0x257   : > { %v1788_v55 = vadd.f32 %v3386_v32, %v1719_v31  ;;  %v1682_v24 = vmul.f32 %v2417_v49, %v1490_v42  ;;  %v1556_v0 = vadd.f32 1e-05, %v1428_v43  ;;  %v3731_v34 = vmul.f32 0.020833334, %v917_v21 }
 0x258   : > { %v1861_v59 = vadd.f32 %v3534_v6, %v1789_v25  ;;  %v1752_v46 = vmul.f32 %v3380_v37, %v1683_v45  ;;  %2422 = vrsqrt.f32 %v1557_v54  ;;  %v1335_v16 = vmul.f32 %v3727_v39, %v3727_v39 }
 0x259   : > { %v1860_v13 = vadd.f32 %v3541_v3, %v1788_v55  ;;  %v1751_v60 = vmul.f32 %v3380_v37, %v1682_v24  ;;  %2424 = vrsqrt.f32 %v1556_v0  ;;  %v983_v14 = vpop.xlane.xlu1 %982  ;;  %v1334_v5 = vmul.f32 %v3731_v34, %v3731_v34 }
 0x25a   : > { %1925 = vst [vmem:[%s2964_s21 + $0xf1] sm:$0xff] %v1861_v59  ;;  %v1821_v40 = vadd.f32 %v3386_v32, %v1752_v46  ;;  %v981_v22 = vpop.xlane.xlu0 %980  ;;  %v3738_v50 = vmul.f32 0.020833334, %v983_v14  ;;  %v1493_v31 = vsub.f32 %v3234_v41, %v3698_v48  ;;  %v1492_v63 = vsub.f32 %v3248_v15, %v3703_v57 }
 0x25b   : > { %1924 = vst [vmem:[%s2964_s21 + $0xe9] sm:$0xff] %v1860_v13  ;;  %v1820_v23 = vadd.f32 %v3386_v32, %v1751_v60  ;;  %v3743_v51 = vmul.f32 0.020833334, %v981_v22 }
 0x25c   : > { %v1893_v28 = vadd.f32 %v3534_v6, %v1821_v40  ;;  %v3850_v6 = vld [vmem:[#allocation17_spill] sm:$0xff]  ;;  %v1367_v19 = vmul.f32 %v3738_v50, %v3738_v50  ;;  %v1463_v40 = vsub.f32 %v3283_v26, %v3727_v39 }
 0x25d   : > { %v1892_v52 = vadd.f32 %v3541_v3, %v1820_v23  ;;  %v1175_v11 = vpop.xlane.xlu1 %1174  ;;  %v1461_v61 = vsub.f32 %v3850_v6, %v3687_v47  ;;  %v1366_v44 = vmul.f32 %v3743_v51, %v3743_v51  ;;  %v1494_v26 = vsub.f32 %v3312_v35, %v3743_v51 }
 0x25e   : > { %1957 = vst [vmem:[%s2964_s21 + $0x211] sm:$0xff] %v1893_v28  ;;  %v1271_v17 = vmul.f32 0.020833334, %v1175_v11  ;;  %v1173_v18 = vpop.xlane.xlu0 %1172  ;;  %v1495_v11 = vsub.f32 %v3298_v12, %v3738_v50 }
 0x25f   : > { %1956 = vst [vmem:[%s2964_s21 + $0x209] sm:$0xff] %v1892_v52  ;;  %v1270_v2 = vmul.f32 0.020833334, %v1173_v18 }
 0x260   : > { %v1399_v3 = vsub.f32 %v1271_v17, %v1335_v16 }
 0x261   : > { %v2419_v10 = vpop.eup %2418  ;;  %v1398_v27 = vsub.f32 %v1270_v2, %v1334_v5  ;;  %v1239_v20 = vpop.xlane.xlu1 %1238 }
 0x262   : > { %v2421_v62 = vpop.eup %2420  ;;  %v1653_v56 = vmul.f32 %v2419_v10, %v1461_v61  ;;  %v1527_v58 = vadd.f32 1e-05, %v1399_v3  ;;  %v1303_v38 = vmul.f32 0.020833334, %v1239_v20  ;;  %v1237_v8 = vpop.xlane.xlu0 %1236 }
 0x263   : > { %v1652_v4 = vmul.f32 %v2421_v62, %v1460_v36  ;;  %v1526_v47 = vadd.f32 1e-05, %v1398_v27  ;;  %v1302_v42 = vmul.f32 0.020833334, %v1237_v8 }
 0x264   : > { %v1722_v9 = vmul.f32 %v3380_v37, %v1653_v56  ;;  %2426 = vrsqrt.f32 %v1527_v58  ;;  %v1431_v53 = vsub.f32 %v1303_v38, %v1367_v19 }
 0x265   : > { %v2423_v43 = vpop.eup %2422  ;;  %v1721_v49 = vmul.f32 %v3380_v37, %v1652_v4  ;;  %2428 = vrsqrt.f32 %v1526_v47  ;;  %v1430_v25 = vsub.f32 %v1302_v42, %v1366_v44 }
 0x266   : > { %v2425_v45 = vpop.eup %2424  ;;  %v1791_v54 = vadd.f32 %v3386_v32, %v1722_v9  ;;  %v1685_v21 = vmul.f32 %v2423_v43, %v1493_v31  ;;  %v1559_v55 = vadd.f32 1e-05, %v1431_v53 }
 0x267   : > { %v1790_v41 = vadd.f32 %v3386_v32, %v1721_v49  ;;  %v1684_v48 = vmul.f32 %v2425_v45, %v1492_v63  ;;  %v1558_v24 = vadd.f32 1e-05, %v1430_v25 }
 0x268   : > { %v1863_v0 = vadd.f32 %v3584_v1, %v1791_v54  ;;  %v1754_v15 = vmul.f32 %v3380_v37, %v1685_v21  ;;  %2430 = vrsqrt.f32 %v1559_v55 }
 0x269   : > { %v1862_v57 = vadd.f32 %v3591_v7, %v1790_v41  ;;  %v1753_v59 = vmul.f32 %v3380_v37, %v1684_v48  ;;  %2432 = vrsqrt.f32 %v1558_v24  ;;  %v1462_v37 = vsub.f32 %v3292_v33, %v3731_v34  ;;  %v2446_v33 = vld [vmem:[%s3800_s2 + $0x2] ss:$0 sm:$0xff] }
 0x26a   : > { %1927 = vst [vmem:[%s2964_s21 + $0x101] sm:$0xff] %v1863_v0  ;;  %v1823_v46 = vadd.f32 %v3386_v32, %v1754_v15 }
 0x26b   : > { %1926 = vst [vmem:[%s2964_s21 + $0xf9] sm:$0xff] %v1862_v57  ;;  %v1822_v13 = vadd.f32 %v3386_v32, %v1753_v59  ;;  %v2445_v32 = vld [vmem:[%s3800_s2 + $0x1] ss:$0 sm:$0xff] }
 0x26c   : > { %v1895_v60 = vadd.f32 %v3584_v1, %v1823_v46 }
 0x26d   : > { %v1894_v14 = vadd.f32 %v3591_v7, %v1822_v13 }
 0x26e   : > { %1959 = vst [vmem:[%s2964_s21 + $0x221] sm:$0xff] %v1895_v60 }
 0x26f   : > { %1958 = vst [vmem:[%s2964_s21 + $0x219] sm:$0xff] %v1894_v14 }
 0x271   : > { %v2427_v22 = vpop.eup %2426 }
 0x272   : > { %v2429_v23 = vpop.eup %2428  ;;  %v1655_v28 = vmul.f32 %v2427_v22, %v1463_v40 }
 0x273   : > { %v1654_v52 = vmul.f32 %v2429_v23, %v1462_v37 }
 0x274   : > { %v1724_v1 = vmul.f32 %v2445_v32, %v1655_v28 }
 0x275   : > { %v2431_v7 = vpop.eup %2430  ;;  %v1723_v39 = vmul.f32 %v2445_v32, %v1654_v52 }
 0x276   : > { %v2433_v16 = vpop.eup %2432  ;;  %v1793_v12 = vadd.f32 %v2446_v33, %v1724_v1  ;;  %v1687_v34 = vmul.f32 %v2431_v7, %v1495_v11 }
 0x277   : > { %v1792_v50 = vadd.f32 %v2446_v33, %v1723_v39  ;;  %v1686_v17 = vmul.f32 %v2433_v16, %v1494_v26 }
 0x278   : > { %v1865_v18 = vadd.f32 %v3634_v29, %v1793_v12  ;;  %v1756_v5 = vmul.f32 %v2445_v32, %v1687_v34 }
 0x279   : > { %v1864_v2 = vadd.f32 %v3641_v30, %v1792_v50  ;;  %v1755_v6 = vmul.f32 %v2445_v32, %v1686_v17 }
 0x27a   : > { %1929 = vst [vmem:[%s2964_s21 + $0x111] sm:$0xff] %v1865_v18  ;;  %v1825_v35 = vadd.f32 %v2446_v33, %v1756_v5 }
 0x27b   : > { %1928 = vst [vmem:[%s2964_s21 + $0x109] sm:$0xff] %v1864_v2  ;;  %v1824_v51 = vadd.f32 %v2446_v33, %v1755_v6 }
 0x27c   : > { %v1897_v61 = vadd.f32 %v3634_v29, %v1825_v35 }
 0x27d   : > { %v1896_v3 = vadd.f32 %v3641_v30, %v1824_v51 }
 0x27e   : > { %1961 = vst [vmem:[%s2964_s21 + $0x231] sm:$0xff] %v1897_v61 }
 0x27f   : > { %1960 = vst [vmem:[%s2964_s21 + $0x229] sm:$0xff] %v1896_v3 }
 0x280 PF: > { %s14_s15 = sadd.s32 1, %s2453_s15  }
 0x281   : > { %p11_p5 = scmp.ge.s32.totalorder %s14_s15, 4  }
 0x283   :  { %13 = sbr.rel (!%p11_p5) target bundleno = 1 (0x1), region = 66 }

</bundles_post_ra>
